<compile_context>
chip_gen: v6e
topology: v6e:2x2x1
jax: 0.10.0
libtpu: 0.0.40
codegen_flags: <defaults>
</compile_context>

<pallas_src>
import functools

import numpy as np

import jax
import jax.numpy as jnp
from jax import lax
from jax.experimental import pallas as pl
from jax.experimental.pallas import tpu as pltpu


NEG_SLOPE = 0.01   # PyTorch LeakyReLU default negative_slope
GN_EPS = 1e-5      # PyTorch GroupNorm default eps


def find_group_number(channels, min_group_channels=4, max_group_channels=32):
    for num_groups in range(channels, 0, -1):
        group_channels = channels // num_groups
        if (channels % num_groups == 0
                and group_channels >= min_group_channels
                and group_channels <= max_group_channels):
            return num_groups
    return 1


def _attention_block_kernel(noise_ref, xf_ref, mask_ref, wct_ref, bc_ref,
                            gamma_ref, beta_ref, gmat_ref, w1_ref, b1_ref,
                            w2_ref, b2_ref, out_ref, *, W, cg):
    """Processes one block of Bt batch samples per grid step."""
    Bt, Cn, HW = noise_ref.shape
    Cb = wct_ref.shape[0]
    K9 = wct_ref.shape[1]
    P = W + 1                           # halo so every 3x3 tap is a valid flat slice
    f32 = jnp.float32

    # ---- build the padded flat noise map in VMEM (no HBM pad pass) ----------
    xflat = noise_ref[...].astype(f32)                              # (Bt, Cn, HW)
    zpad = jnp.zeros((Bt, Cn, P), f32)
    xpad = jnp.concatenate([zpad, xflat, zpad], axis=-1)            # (Bt, Cn, HW+2P)

    # Column masks (precomputed, 0/1):
    #   row 0: zero where source column == W-1  -> used by dw = -1 taps
    #   row 1: zero where source column == 0    -> used by dw = +1 taps
    # Vertical (row) wrap already reads the zero halo, so no other masks are
    # needed and every conv output lane is a real pixel.
    xpad_zr = xpad * mask_ref[0:1, :]
    xpad_zl = xpad * mask_ref[1:2, :]
    srcs = (xpad_zr, xpad, xpad_zl)     # indexed by dw in {0,1,2}

    # ---- 3x3 conv (pad=1) as one batched matmul over 9 shifted windows ------
    windows = []
    for dh in range(3):
        for dw in range(3):
            start = P + (dh - 1) * W + (dw - 1)
            windows.append(srcs[dw][:, :, start:start + HW])        # (Bt, Cn, HW)
    rhs = jnp.concatenate(windows, axis=1)                          # (Bt, 9*Cn, HW)

    wct_b = jnp.broadcast_to(wct_ref[...][None], (Bt, Cb, K9))      # small replicate
    c0 = jnp.einsum('bck,bkn->bcn', wct_b, rhs,
                    preferred_element_type=f32)                     # (Bt, Cb, HW), no bias

    # ---- GroupNorm statistics with the conv bias folded in analytically -----
    bc = bc_ref[...]                                                # (1, Cb)
    s1 = jnp.sum(c0, axis=-1)                                       # (Bt, Cb)
    s2 = jnp.sum(c0 * c0, axis=-1)                                  # (Bt, Cb)
    hw_f = jnp.float32(HW)
    ch_sum = s1 + hw_f * bc
    ch_sq = s2 + 2.0 * bc * s1 + hw_f * bc * bc
    g_sum = jnp.dot(ch_sum, gmat_ref[...], preferred_element_type=f32)
    g_sq = jnp.dot(ch_sq, gmat_ref[...], preferred_element_type=f32)
    inv_n = jnp.float32(1.0 / (HW * cg))
    mean = g_sum * inv_n
    var = jnp.maximum(g_sq * inv_n - mean * mean, 0.0)              # biased var, clamped
    inv = lax.rsqrt(var + GN_EPS)

    scale = inv * gamma_ref[...]                                    # (Bt, Cb)
    shift = beta_ref[...] + (bc - mean) * scale                     # (Bt, Cb)

    # ---- fused affine + LeakyReLU + spatial mean -> noise_context -----------
    y = c0 * scale[:, :, None] + shift[:, :, None]                  # single FMA pass
    y = jnp.where(y > 0, y, NEG_SLOPE * y)
    noise_ctx = jnp.sum(y, axis=-1) * jnp.float32(1.0 / HW)         # (Bt, Cb)

    # ---- Global average pool of x --------------------------------------------
    xpool = jnp.sum(xf_ref[...].astype(f32), axis=-1) * jnp.float32(1.0 / HW)  # (Bt, Cin)

    # ---- Dense -> +noise_ctx -> LeakyReLU -> Dense_2 -> softmax(T) -----------
    h = (jnp.dot(xpool, w1_ref[...], preferred_element_type=f32)
         + b1_ref[...] + noise_ctx)                                 # (Bt, Cb)
    h = jnp.where(h > 0, h, NEG_SLOPE * h)
    # 1/temperature is pre-folded into w2/b2 by the wrapper.
    logits = jnp.dot(h, w2_ref[...],
                     preferred_element_type=f32) + b2_ref[...]      # (Bt, Co)
    logits = logits - jnp.max(logits, axis=-1, keepdims=True)
    e = jnp.exp(logits)
    out_ref[...] = (e / jnp.sum(e, axis=-1, keepdims=True)).astype(out_ref.dtype)


def attention_block_forward(x, noise_map, temperature, params, num_groups,
                            block_b=64):
    """x: (B, Cin, H, W) NCHW; noise_map: (B, Cn, H, W) NCHW."""
    wc, bc, gamma, beta, w1, b1, w2, b2 = params
    B, Cin, H, W = x.shape
    Cn = noise_map.shape[1]
    Cb = wc.shape[-1]
    Co = w2.shape[-1]
    HW = H * W
    P = W + 1
    Lp = HW + 2 * P
    K9 = 9 * Cn
    cg = Cb // num_groups

    # ---- batch tiling: big tiles, but keep >=2 grid steps when possible so a
    # v7x megacore can shard the "parallel" batch axis across its two TCs. ----
    Bt = min(int(block_b), B)
    if B >= 16:
        Bt = min(Bt, (B + 1) // 2)
    if Bt < B:
        Bt = max(8, (Bt // 8) * 8)      # sublane-aligned tiles when actually tiling
    Bp = ((B + Bt - 1) // Bt) * Bt

    # ---------------- layout glue (free reshapes, native dtype) --------------
    noise_flat = noise_map.reshape(B, Cn, HW)          # no pad, no upcast in HBM
    xf = x.reshape(B, Cin, HW)
    if Bp != B:
        noise_flat = jnp.pad(noise_flat, ((0, Bp - B), (0, 0), (0, 0)))
        xf = jnp.pad(xf, ((0, Bp - B), (0, 0), (0, 0)))

    # Column masks over the in-kernel padded flat coordinate q (source column
    # is (q - P) % W inside the real region; halo positions are already zero).
    q = np.arange(Lp)
    col = (q - P) % W
    in_real = (q >= P) & (q < P + HW)
    m_zr = np.where(in_real & (col == W - 1), 0.0, 1.0)   # for dw = -1 taps
    m_zl = np.where(in_real & (col == 0), 0.0, 1.0)       # for dw = +1 taps
    masks = jnp.asarray(np.stack([m_zr, m_zl]).astype(np.float32))   # (2, Lp)

    # block-diagonal group matrix (hoisted out of the kernel)
    gidx = np.arange(Cb) // cg
    gmat = jnp.asarray((gidx[:, None] == gidx[None, :]).astype(np.float32))

    wct = wc.reshape(K9, Cb).T.astype(jnp.float32)      # (Cb, 9*Cn), tap-major
    bc2 = bc.reshape(1, Cb).astype(jnp.float32)
    gamma2 = gamma.reshape(1, Cb).astype(jnp.float32)
    beta2 = beta.reshape(1, Cb).astype(jnp.float32)
    w1f = w1.astype(jnp.float32)
    b1_2 = b1.reshape(1, Cb).astype(jnp.float32)
    inv_t = jnp.float32(1.0) / jnp.asarray(temperature, jnp.float32)
    w2s = (w2 * inv_t).astype(jnp.float32)              # fold 1/temperature into Dense_2
    b2s = (b2 * inv_t).reshape(1, Co).astype(jnp.float32)

    kernel = functools.partial(_attention_block_kernel, W=W, cg=cg)

    out = pl.pallas_call(
        kernel,
        out_shape=jax.ShapeDtypeStruct((Bp, Co), jnp.float32),
        grid_spec=pltpu.PrefetchScalarGridSpec(
            num_scalar_prefetch=0,
            grid=(Bp // Bt,),
            in_specs=[
                pl.BlockSpec((Bt, Cn, HW), lambda b: (b, 0, 0)),   # noise (flat, unpadded)
                pl.BlockSpec((Bt, Cin, HW), lambda b: (b, 0, 0)),  # x (flat)
                pl.BlockSpec((2, Lp), lambda b: (0, 0)),           # column masks
                pl.BlockSpec((Cb, K9), lambda b: (0, 0)),          # conv weight (Cb, 9*Cn)
                pl.BlockSpec((1, Cb), lambda b: (0, 0)),           # conv bias
                pl.BlockSpec((1, Cb), lambda b: (0, 0)),           # GN gamma
                pl.BlockSpec((1, Cb), lambda b: (0, 0)),           # GN beta
                pl.BlockSpec((Cb, Cb), lambda b: (0, 0)),          # group matrix
                pl.BlockSpec((Cin, Cb), lambda b: (0, 0)),         # Dense W
                pl.BlockSpec((1, Cb), lambda b: (0, 0)),           # Dense b
                pl.BlockSpec((Cb, Co), lambda b: (0, 0)),          # Dense_2 W (pre-scaled 1/T)
                pl.BlockSpec((1, Co), lambda b: (0, 0)),           # Dense_2 b (pre-scaled 1/T)
            ],
            out_specs=pl.BlockSpec((Bt, Co), lambda b: (b, 0)),
        ),
        compiler_params=pltpu.CompilerParams(
            dimension_semantics=("parallel",),
            vmem_limit_bytes=48 * 1024 * 1024),
    )(noise_flat, xf, masks, wct, bc2, gamma2, beta2, gmat, w1f, b1_2, w2s, b2s)

    return out[:B]


def reference_forward(x, noise_map, temperature, params, num_groups):
    """Pure-JAX reference matching the PyTorch module semantics."""
    wc, bc, gamma, beta, w1, b1, w2, b2 = params
    noise_nhwc = jnp.transpose(noise_map, (0, 2, 3, 1))
    conv = lax.conv_general_dilated(
        noise_nhwc, wc, window_strides=(1, 1), padding="SAME",
        dimension_numbers=("NHWC", "HWIO", "NHWC")) + bc
    B, H, W, Cb = conv.shape
    g = conv.reshape(B, H * W, num_groups, Cb // num_groups)
    mean = g.mean(axis=(1, 3), keepdims=True)
    var = ((g - mean) ** 2).mean(axis=(1, 3), keepdims=True)
    g = (g - mean) / jnp.sqrt(var + GN_EPS)
    y = g.reshape(B, H, W, Cb) * gamma + beta
    y = jnp.where(y > 0, y, NEG_SLOPE * y)
    noise_ctx = y.mean(axis=(1, 2))                                  # (B, Cb)
    xp = jnp.transpose(x, (0, 2, 3, 1)).mean(axis=(1, 2))            # (B, Cin)
    h = xp @ w1 + b1 + noise_ctx
    h = jnp.where(h > 0, h, NEG_SLOPE * h)
    logits = (h @ w2 + b2) / temperature
    return jax.nn.softmax(logits, axis=-1)


if __name__ == "__main__":
    # Small shapes consistent with the module.
    B, Cin, H, W = 2, 4, 16, 16          # x: (B, in_channels, H, W)
    Cn = 3                               # noise_channels
    Cb = 32                              # bottleneck_units
    Co = 8                               # out_channels
    temperature = 0.5
    num_groups = find_group_number(Cb)   # -> 8 groups of 4 channels

    key = jax.random.PRNGKey(0)
    ks = jax.random.split(key, 10)
    wc = 0.1 * jax.random.normal(ks[0], (3, 3, Cn, Cb), jnp.float32)   # HWIO
    bc = 0.05 * jax.random.normal(ks[1], (Cb,), jnp.float32)
    gamma = 1.0 + 0.1 * jax.random.normal(ks[2], (Cb,), jnp.float32)
    beta = 0.05 * jax.random.normal(ks[3], (Cb,), jnp.float32)
    w1 = 0.1 * jax.random.normal(ks[4], (Cin, Cb), jnp.float32)        # Dense
    b1 = 0.05 * jax.random.normal(ks[5], (Cb,), jnp.float32)
    w2 = 0.1 * jax.random.normal(ks[6], (Cb, Co), jnp.float32)         # Dense_2
    b2 = 0.05 * jax.random.normal(ks[7], (Co,), jnp.float32)
    x = jax.random.normal(ks[8], (B, Cin, H, W), jnp.float32)
    noise_map = jax.random.normal(ks[9], (B, Cn, H, W), jnp.float32)

    params = (wc, bc, gamma, beta, w1, b1, w2, b2)

    out = attention_block_forward(x, noise_map, temperature, params, num_groups)
    out = jax.block_until_ready(out)

    ref = jax.block_until_ready(
        reference_forward(x, noise_map, temperature, params, num_groups))

    out_np = np.asarray(out)
    ref_np = np.asarray(ref)
    assert out_np.shape == (B, Co), out_np.shape
    assert np.allclose(out_np.sum(axis=-1), 1.0, atol=1e-5)
    assert np.allclose(out_np, ref_np, rtol=1e-4, atol=1e-5), \
        f"max abs diff = {np.abs(out_np - ref_np).max()}"

    print("KERNEL_OK")
</pallas_src>

<mosaic_0001>
module attributes {stable_mosaic.version = 11 : i64} {
  func.func @_attention_block_kernel(%arg0: i32, %arg1: memref<2x3x256xf32, #tpu.memory_space<vmem>>, %arg2: memref<2x4x256xf32, #tpu.memory_space<vmem>>, %arg3: memref<2x290xf32, #tpu.memory_space<vmem>>, %arg4: memref<32x27xf32, #tpu.memory_space<vmem>>, %arg5: memref<1x32xf32, #tpu.memory_space<vmem>>, %arg6: memref<1x32xf32, #tpu.memory_space<vmem>>, %arg7: memref<1x32xf32, #tpu.memory_space<vmem>>, %arg8: memref<32x32xf32, #tpu.memory_space<vmem>>, %arg9: memref<4x32xf32, #tpu.memory_space<vmem>>, %arg10: memref<1x32xf32, #tpu.memory_space<vmem>>, %arg11: memref<32x8xf32, #tpu.memory_space<vmem>>, %arg12: memref<1x8xf32, #tpu.memory_space<vmem>>, %arg13: memref<2x8xf32, #tpu.memory_space<vmem>>) attributes {dimension_semantics = [#tpu.dimension_semantics<parallel>], iteration_bounds = array<i64: 1>, scalar_prefetch = 0 : i64, scratch_operands = 0 : i64, tpu.core_type = #tpu.core_type<tc>, window_params = [{transform_indices = @transform_0, window_bounds = array<i64: 2, 3, 256>}, {transform_indices = @transform_1, window_bounds = array<i64: 2, 4, 256>}, {pipeline_mode = #tpu.pipeline_mode<synchronous>, transform_indices = @transform_2, window_bounds = array<i64: 2, 290>}, {pipeline_mode = #tpu.pipeline_mode<synchronous>, transform_indices = @transform_3, window_bounds = array<i64: 32, 27>}, {pipeline_mode = #tpu.pipeline_mode<synchronous>, transform_indices = @transform_4, window_bounds = array<i64: 1, 32>}, {pipeline_mode = #tpu.pipeline_mode<synchronous>, transform_indices = @transform_5, window_bounds = array<i64: 1, 32>}, {pipeline_mode = #tpu.pipeline_mode<synchronous>, transform_indices = @transform_6, window_bounds = array<i64: 1, 32>}, {pipeline_mode = #tpu.pipeline_mode<synchronous>, transform_indices = @transform_7, window_bounds = array<i64: 32, 32>}, {pipeline_mode = #tpu.pipeline_mode<synchronous>, transform_indices = @transform_8, window_bounds = array<i64: 4, 32>}, {pipeline_mode = #tpu.pipeline_mode<synchronous>, transform_indices = @transform_9, window_bounds = array<i64: 1, 32>}, {pipeline_mode = #tpu.pipeline_mode<synchronous>, transform_indices = @transform_10, window_bounds = array<i64: 32, 8>}, {pipeline_mode = #tpu.pipeline_mode<synchronous>, transform_indices = @transform_11, window_bounds = array<i64: 1, 8>}, {transform_indices = @transform_12, window_bounds = array<i64: 2, 8>}]} {
    %c0 = arith.constant 0 : index
    %c0_0 = arith.constant 0 : index
    %c0_1 = arith.constant 0 : index
    %0 = vector.load %arg1[%c0, %c0_0, %c0_1] : memref<2x3x256xf32, #tpu.memory_space<vmem>>, vector<2x3x256xf32>
    %cst = arith.constant 0.000000e+00 : f32
    %1 = vector.broadcast %cst : f32 to vector<2x3x17xf32>
    %2 = tpu.concatenate %1, %0, %1 in 2 : vector<2x3x17xf32>, vector<2x3x256xf32>, vector<2x3x17xf32> -> vector<2x3x290xf32>
    %c0_2 = arith.constant 0 : index
    %c0_3 = arith.constant 0 : index
    %3 = vector.load %arg3[%c0_2, %c0_3] : memref<2x290xf32, #tpu.memory_space<vmem>>, vector<1x290xf32>
    %4 = vector.shape_cast %3 : vector<1x290xf32> to vector<1x1x290xf32>
    %5 = vector.broadcast %4 : vector<1x1x290xf32> to vector<2x3x290xf32>
    %6 = arith.mulf %2, %5 : vector<2x3x290xf32>
    %c1 = arith.constant 1 : index
    %c0_4 = arith.constant 0 : index
    %7 = vector.load %arg3[%c1, %c0_4] : memref<2x290xf32, #tpu.memory_space<vmem>>, vector<1x290xf32>
    %8 = vector.shape_cast %7 : vector<1x290xf32> to vector<1x1x290xf32>
    %9 = vector.broadcast %8 : vector<1x1x290xf32> to vector<2x3x290xf32>
    %10 = arith.mulf %2, %9 : vector<2x3x290xf32>
    %11 = vector.extract_strided_slice %6 {offsets = [0, 0, 0], sizes = [2, 3, 256], strides = [1, 1, 1]} : vector<2x3x290xf32> to vector<2x3x256xf32>
    %12 = vector.extract_strided_slice %2 {offsets = [0, 0, 1], sizes = [2, 3, 256], strides = [1, 1, 1]} : vector<2x3x290xf32> to vector<2x3x256xf32>
    %13 = vector.extract_strided_slice %10 {offsets = [0, 0, 2], sizes = [2, 3, 256], strides = [1, 1, 1]} : vector<2x3x290xf32> to vector<2x3x256xf32>
    %14 = vector.extract_strided_slice %6 {offsets = [0, 0, 16], sizes = [2, 3, 256], strides = [1, 1, 1]} : vector<2x3x290xf32> to vector<2x3x256xf32>
    %15 = vector.extract_strided_slice %2 {offsets = [0, 0, 17], sizes = [2, 3, 256], strides = [1, 1, 1]} : vector<2x3x290xf32> to vector<2x3x256xf32>
    %16 = vector.extract_strided_slice %10 {offsets = [0, 0, 18], sizes = [2, 3, 256], strides = [1, 1, 1]} : vector<2x3x290xf32> to vector<2x3x256xf32>
    %17 = vector.extract_strided_slice %6 {offsets = [0, 0, 32], sizes = [2, 3, 256], strides = [1, 1, 1]} : vector<2x3x290xf32> to vector<2x3x256xf32>
    %18 = vector.extract_strided_slice %2 {offsets = [0, 0, 33], sizes = [2, 3, 256], strides = [1, 1, 1]} : vector<2x3x290xf32> to vector<2x3x256xf32>
    %19 = vector.extract_strided_slice %10 {offsets = [0, 0, 34], sizes = [2, 3, 256], strides = [1, 1, 1]} : vector<2x3x290xf32> to vector<2x3x256xf32>
    %20 = tpu.concatenate %11, %12, %13, %14, %15, %16, %17, %18, %19 in 1 : vector<2x3x256xf32>, vector<2x3x256xf32>, vector<2x3x256xf32>, vector<2x3x256xf32>, vector<2x3x256xf32>, vector<2x3x256xf32>, vector<2x3x256xf32>, vector<2x3x256xf32>, vector<2x3x256xf32> -> vector<2x27x256xf32>
    %c0_5 = arith.constant 0 : index
    %c0_6 = arith.constant 0 : index
    %21 = vector.load %arg4[%c0_5, %c0_6] : memref<32x27xf32, #tpu.memory_space<vmem>>, vector<32x27xf32>
    %22 = vector.shape_cast %21 : vector<32x27xf32> to vector<1x32x27xf32>
    %23 = vector.shape_cast %22 : vector<1x32x27xf32> to vector<1x32x27xf32>
    %24 = vector.broadcast %23 : vector<1x32x27xf32> to vector<2x32x27xf32>
    "tpu.trace_start"() <{level = 10 : i32, message = "bck,bkn->bcn"}> : () -> ()
    %cst_7 = arith.constant dense<0.000000e+00> : vector<2x32x256xf32>
    %25 = tpu.matmul %24, %20, %cst_7 {dimension_numbers = #tpu.dot_dimension_numbers<[2], [1], [1], [2], [0, 0, 0, 1, 1, 2], [0], [0]>} : vector<2x32x27xf32>, vector<2x27x256xf32>, vector<2x32x256xf32> -> vector<2x32x256xf32>
    "tpu.trace_stop"() : () -> ()
    %c0_8 = arith.constant 0 : index
    %c0_9 = arith.constant 0 : index
    %26 = vector.load %arg5[%c0_8, %c0_9] : memref<1x32xf32, #tpu.memory_space<vmem>>, vector<1x32xf32>
    %cst_10 = arith.constant dense<0.000000e+00> : vector<2x32xf32>
    %27 = vector.multi_reduction <add>, %25, %cst_10 [2] : vector<2x32x256xf32> to vector<2x32xf32>
    %28 = arith.mulf %25, %25 : vector<2x32x256xf32>
    %cst_11 = arith.constant dense<0.000000e+00> : vector<2x32xf32>
    %29 = vector.multi_reduction <add>, %28, %cst_11 [2] : vector<2x32x256xf32> to vector<2x32xf32>
    %cst_12 = arith.constant 2.560000e+02 : f32
    %30 = vector.broadcast %cst_12 : f32 to vector<1x32xf32>
    %31 = arith.mulf %30, %26 : vector<1x32xf32>
    %32 = vector.broadcast %31 : vector<1x32xf32> to vector<2x32xf32>
    %33 = arith.addf %27, %32 : vector<2x32xf32>
    %cst_13 = arith.constant 2.000000e+00 : f32
    %34 = vector.broadcast %cst_13 : f32 to vector<1x32xf32>
    %35 = arith.mulf %34, %26 : vector<1x32xf32>
    %36 = vector.broadcast %35 : vector<1x32xf32> to vector<2x32xf32>
    %37 = arith.mulf %36, %27 : vector<2x32xf32>
    %38 = arith.addf %29, %37 : vector<2x32xf32>
    %cst_14 = arith.constant 2.560000e+02 : f32
    %39 = vector.broadcast %cst_14 : f32 to vector<1x32xf32>
    %40 = arith.mulf %39, %26 : vector<1x32xf32>
    %41 = arith.mulf %40, %26 : vector<1x32xf32>
    %42 = vector.broadcast %41 : vector<1x32xf32> to vector<2x32xf32>
    %43 = arith.addf %38, %42 : vector<2x32xf32>
    %c0_15 = arith.constant 0 : index
    %c0_16 = arith.constant 0 : index
    %44 = vector.load %arg8[%c0_15, %c0_16] : memref<32x32xf32, #tpu.memory_space<vmem>>, vector<32x32xf32>
    %cst_17 = arith.constant dense<0.000000e+00> : vector<2x32xf32>
    %45 = tpu.matmul %33, %44, %cst_17 {dimension_numbers = #tpu.dot_dimension_numbers<[1], [0], [0], [1], [0, 0, 1, 1], [], []>} : vector<2x32xf32>, vector<32x32xf32>, vector<2x32xf32> -> vector<2x32xf32>
    %c0_18 = arith.constant 0 : index
    %c0_19 = arith.constant 0 : index
    %46 = vector.load %arg8[%c0_18, %c0_19] : memref<32x32xf32, #tpu.memory_space<vmem>>, vector<32x32xf32>
    %cst_20 = arith.constant dense<0.000000e+00> : vector<2x32xf32>
    %47 = tpu.matmul %43, %46, %cst_20 {dimension_numbers = #tpu.dot_dimension_numbers<[1], [0], [0], [1], [0, 0, 1, 1], [], []>} : vector<2x32xf32>, vector<32x32xf32>, vector<2x32xf32> -> vector<2x32xf32>
    %cst_21 = arith.constant 9.765625E-4 : f32
    %48 = vector.broadcast %cst_21 : f32 to vector<2x32xf32>
    %49 = arith.mulf %45, %48 : vector<2x32xf32>
    %cst_22 = arith.constant 9.765625E-4 : f32
    %50 = vector.broadcast %cst_22 : f32 to vector<2x32xf32>
    %51 = arith.mulf %47, %50 : vector<2x32xf32>
    %52 = arith.mulf %49, %49 : vector<2x32xf32>
    %53 = arith.subf %51, %52 : vector<2x32xf32>
    %cst_23 = arith.constant 0.000000e+00 : f32
    %54 = vector.broadcast %cst_23 : f32 to vector<2x32xf32>
    %55 = arith.maximumf %53, %54 : vector<2x32xf32>
    %cst_24 = arith.constant 9.99999974E-6 : f32
    %56 = vector.broadcast %cst_24 : f32 to vector<2x32xf32>
    %57 = arith.addf %55, %56 : vector<2x32xf32>
    %58 = math.rsqrt %57 : vector<2x32xf32>
    %c0_25 = arith.constant 0 : index
    %c0_26 = arith.constant 0 : index
    %59 = vector.load %arg6[%c0_25, %c0_26] : memref<1x32xf32, #tpu.memory_space<vmem>>, vector<1x32xf32>
    %60 = vector.broadcast %59 : vector<1x32xf32> to vector<2x32xf32>
    %61 = arith.mulf %58, %60 : vector<2x32xf32>
    %c0_27 = arith.constant 0 : index
    %c0_28 = arith.constant 0 : index
    %62 = vector.load %arg7[%c0_27, %c0_28] : memref<1x32xf32, #tpu.memory_space<vmem>>, vector<1x32xf32>
    %63 = vector.broadcast %26 : vector<1x32xf32> to vector<2x32xf32>
    %64 = arith.subf %63, %49 : vector<2x32xf32>
    %65 = arith.mulf %64, %61 : vector<2x32xf32>
    %66 = vector.broadcast %62 : vector<1x32xf32> to vector<2x32xf32>
    %67 = arith.addf %66, %65 : vector<2x32xf32>
    %68 = vector.shape_cast %61 : vector<2x32xf32> to vector<2x32x1xf32>
    %69 = vector.broadcast %68 : vector<2x32x1xf32> to vector<2x32x256xf32>
    %70 = arith.mulf %25, %69 : vector<2x32x256xf32>
    %71 = vector.shape_cast %67 : vector<2x32xf32> to vector<2x32x1xf32>
    %72 = vector.broadcast %71 : vector<2x32x1xf32> to vector<2x32x256xf32>
    %73 = arith.addf %70, %72 : vector<2x32x256xf32>
    %cst_29 = arith.constant 0.000000e+00 : f32
    %74 = vector.broadcast %cst_29 : f32 to vector<2x32x256xf32>
    %75 = arith.cmpf ogt, %73, %74 : vector<2x32x256xf32>
    %cst_30 = arith.constant 0.00999999977 : f32
    %76 = vector.broadcast %cst_30 : f32 to vector<2x32x256xf32>
    %77 = arith.mulf %76, %73 : vector<2x32x256xf32>
    %78 = arith.select %75, %73, %77 : vector<2x32x256xi1>, vector<2x32x256xf32>
    %cst_31 = arith.constant dense<0.000000e+00> : vector<2x32xf32>
    %79 = vector.multi_reduction <add>, %78, %cst_31 [2] : vector<2x32x256xf32> to vector<2x32xf32>
    %cst_32 = arith.constant 3.906250e-03 : f32
    %80 = vector.broadcast %cst_32 : f32 to vector<2x32xf32>
    %81 = arith.mulf %79, %80 : vector<2x32xf32>
    %c0_33 = arith.constant 0 : index
    %c0_34 = arith.constant 0 : index
    %c0_35 = arith.constant 0 : index
    %82 = vector.load %arg2[%c0_33, %c0_34, %c0_35] : memref<2x4x256xf32, #tpu.memory_space<vmem>>, vector<2x4x256xf32>
    %cst_36 = arith.constant dense<0.000000e+00> : vector<2x4xf32>
    %83 = vector.multi_reduction <add>, %82, %cst_36 [2] : vector<2x4x256xf32> to vector<2x4xf32>
    %cst_37 = arith.constant 3.906250e-03 : f32
    %84 = vector.broadcast %cst_37 : f32 to vector<2x4xf32>
    %85 = arith.mulf %83, %84 : vector<2x4xf32>
    %c0_38 = arith.constant 0 : index
    %c0_39 = arith.constant 0 : index
    %86 = vector.load %arg9[%c0_38, %c0_39] : memref<4x32xf32, #tpu.memory_space<vmem>>, vector<4x32xf32>
    %cst_40 = arith.constant dense<0.000000e+00> : vector<2x32xf32>
    %87 = tpu.matmul %85, %86, %cst_40 {dimension_numbers = #tpu.dot_dimension_numbers<[1], [0], [0], [1], [0, 0, 1, 1], [], []>} : vector<2x4xf32>, vector<4x32xf32>, vector<2x32xf32> -> vector<2x32xf32>
    %c0_41 = arith.constant 0 : index
    %c0_42 = arith.constant 0 : index
    %88 = vector.load %arg10[%c0_41, %c0_42] : memref<1x32xf32, #tpu.memory_space<vmem>>, vector<1x32xf32>
    %89 = vector.broadcast %88 : vector<1x32xf32> to vector<2x32xf32>
    %90 = arith.addf %87, %89 : vector<2x32xf32>
    %91 = arith.addf %90, %81 : vector<2x32xf32>
    %cst_43 = arith.constant 0.000000e+00 : f32
    %92 = vector.broadcast %cst_43 : f32 to vector<2x32xf32>
    %93 = arith.cmpf ogt, %91, %92 : vector<2x32xf32>
    %cst_44 = arith.constant 0.00999999977 : f32
    %94 = vector.broadcast %cst_44 : f32 to vector<2x32xf32>
    %95 = arith.mulf %94, %91 : vector<2x32xf32>
    %96 = arith.select %93, %91, %95 : vector<2x32xi1>, vector<2x32xf32>
    %c0_45 = arith.constant 0 : index
    %c0_46 = arith.constant 0 : index
    %97 = vector.load %arg11[%c0_45, %c0_46] : memref<32x8xf32, #tpu.memory_space<vmem>>, vector<32x8xf32>
    %cst_47 = arith.constant dense<0.000000e+00> : vector<2x8xf32>
    %98 = tpu.matmul %96, %97, %cst_47 {dimension_numbers = #tpu.dot_dimension_numbers<[1], [0], [0], [1], [0, 0, 1, 1], [], []>} : vector<2x32xf32>, vector<32x8xf32>, vector<2x8xf32> -> vector<2x8xf32>
    %c0_48 = arith.constant 0 : index
    %c0_49 = arith.constant 0 : index
    %99 = vector.load %arg12[%c0_48, %c0_49] : memref<1x8xf32, #tpu.memory_space<vmem>>, vector<1x8xf32>
    %100 = vector.broadcast %99 : vector<1x8xf32> to vector<2x8xf32>
    %101 = arith.addf %98, %100 : vector<2x8xf32>
    %cst_50 = arith.constant dense<0xFF800000> : vector<2xf32>
    %102 = vector.multi_reduction <maximumf>, %101, %cst_50 [1] : vector<2x8xf32> to vector<2xf32>
    %103 = vector.shape_cast %102 : vector<2xf32> to vector<2x1xf32>
    %104 = vector.broadcast %103 : vector<2x1xf32> to vector<2x8xf32>
    %105 = arith.subf %101, %104 : vector<2x8xf32>
    %106 = math.exp %105 : vector<2x8xf32>
    %cst_51 = arith.constant dense<0.000000e+00> : vector<2xf32>
    %107 = vector.multi_reduction <add>, %106, %cst_51 [1] : vector<2x8xf32> to vector<2xf32>
    %108 = vector.shape_cast %107 : vector<2xf32> to vector<2x1xf32>
    %109 = vector.broadcast %108 : vector<2x1xf32> to vector<2x8xf32>
    %110 = arith.divf %106, %109 : vector<2x8xf32>
    %c0_52 = arith.constant 0 : index
    %c0_53 = arith.constant 0 : index
    %111 = vector.load %arg13[%c0_52, %c0_53] : memref<2x8xf32, #tpu.memory_space<vmem>>, vector<2x8xf32>
    tpu.vector_store %arg13[%c0_52, %c0_53], %110 {strides = array<i32>} : memref<2x8xf32, #tpu.memory_space<vmem>>, vector<2x8xf32>,
    return
  }
  func.func @transform_0(%arg0: i32) -> (i32, i32, i32) {
    %c0_i32 = arith.constant 0 : i32
    %c0_i32_0 = arith.constant 0 : i32
    %c0_i32_1 = arith.constant 0 : i32
    return %arg0, %c0_i32, %c0_i32_0 : i32, i32, i32
  }
  func.func @transform_1(%arg0: i32) -> (i32, i32, i32) {
    %c0_i32 = arith.constant 0 : i32
    %c0_i32_0 = arith.constant 0 : i32
    %c0_i32_1 = arith.constant 0 : i32
    return %arg0, %c0_i32, %c0_i32_0 : i32, i32, i32
  }
  func.func @transform_2(%arg0: i32) -> (i32, i32) {
    %c0_i32 = arith.constant 0 : i32
    %c0_i32_0 = arith.constant 0 : i32
    %c0_i32_1 = arith.constant 0 : i32
    return %c0_i32, %c0_i32_0 : i32, i32
  }
  func.func @transform_3(%arg0: i32) -> (i32, i32) {
    %c0_i32 = arith.constant 0 : i32
    %c0_i32_0 = arith.constant 0 : i32
    %c0_i32_1 = arith.constant 0 : i32
    return %c0_i32, %c0_i32_0 : i32, i32
  }
  func.func @transform_4(%arg0: i32) -> (i32, i32) {
    %c0_i32 = arith.constant 0 : i32
    %c0_i32_0 = arith.constant 0 : i32
    %c0_i32_1 = arith.constant 0 : i32
    return %c0_i32, %c0_i32_0 : i32, i32
  }
  func.func @transform_5(%arg0: i32) -> (i32, i32) {
    %c0_i32 = arith.constant 0 : i32
    %c0_i32_0 = arith.constant 0 : i32
    %c0_i32_1 = arith.constant 0 : i32
    return %c0_i32, %c0_i32_0 : i32, i32
  }
  func.func @transform_6(%arg0: i32) -> (i32, i32) {
    %c0_i32 = arith.constant 0 : i32
    %c0_i32_0 = arith.constant 0 : i32
    %c0_i32_1 = arith.constant 0 : i32
    return %c0_i32, %c0_i32_0 : i32, i32
  }
  func.func @transform_7(%arg0: i32) -> (i32, i32) {
    %c0_i32 = arith.constant 0 : i32
    %c0_i32_0 = arith.constant 0 : i32
    %c0_i32_1 = arith.constant 0 : i32
    return %c0_i32, %c0_i32_0 : i32, i32
  }
  func.func @transform_8(%arg0: i32) -> (i32, i32) {
    %c0_i32 = arith.constant 0 : i32
    %c0_i32_0 = arith.constant 0 : i32
    %c0_i32_1 = arith.constant 0 : i32
    return %c0_i32, %c0_i32_0 : i32, i32
  }
  func.func @transform_9(%arg0: i32) -> (i32, i32) {
    %c0_i32 = arith.constant 0 : i32
    %c0_i32_0 = arith.constant 0 : i32
    %c0_i32_1 = arith.constant 0 : i32
    return %c0_i32, %c0_i32_0 : i32, i32
  }
  func.func @transform_10(%arg0: i32) -> (i32, i32) {
    %c0_i32 = arith.constant 0 : i32
    %c0_i32_0 = arith.constant 0 : i32
    %c0_i32_1 = arith.constant 0 : i32
    return %c0_i32, %c0_i32_0 : i32, i32
  }
  func.func @transform_11(%arg0: i32) -> (i32, i32) {
    %c0_i32 = arith.constant 0 : i32
    %c0_i32_0 = arith.constant 0 : i32
    %c0_i32_1 = arith.constant 0 : i32
    return %c0_i32, %c0_i32_0 : i32, i32
  }
  func.func @transform_12(%arg0: i32) -> (i32, i32) {
    %c0_i32 = arith.constant 0 : i32
    %c0_i32_0 = arith.constant 0 : i32
    return %arg0, %c0_i32 : i32, i32
  }
}

</mosaic_0001>

<bundles_post_ra>
// kernel: tpu_custom_call.1
= control target key start
LH: loop header
LB: loop body
LE: loop exit
PB: predicated region body
PF: predicated region fallthrough
CT: control target
= control target key end

     0   :  { %17 = vsyncpa [#allocation3], 0  ;;  %s2548_s0 = inlined_call_operand.vmem [shape: f32[2,3,256], index: 0, kind: input, shape index: {}]   ;;  %s2549_s1 = inlined_call_operand.hbm [shape: f32[2,4,256], index: 1, kind: input, shape index: {}]   ;;  %s2550_s2 = inlined_call_operand.hbm [shape: f32[2,290], index: 2, kind: input, shape index: {}]   ;;  %s2551_s3 = inlined_call_operand.vmem [shape: f32[32,27], index: 3, kind: input, shape index: {}]   ;;  %s2552_s4 = inlined_call_operand.vmem [shape: f32[1,32], index: 4, kind: input, shape index: {}]   ;;  %s2553_s5 = inlined_call_operand.hbm [shape: f32[1,32], index: 5, kind: input, shape index: {}]   ;;  %s2554_s6 = inlined_call_operand.vmem [shape: f32[1,32], index: 6, kind: input, shape index: {}]   ;;  %s2555_s7 = inlined_call_operand.vmem [shape: f32[32,32], index: 7, kind: input, shape index: {}]   ;;  %s2556_s8 = inlined_call_operand.vmem [shape: f32[4,32], index: 8, kind: input, shape index: {}]   ;;  %s2557_s9 = inlined_call_operand.vmem [shape: f32[1,32], index: 9, kind: input, shape index: {}]   ;;  %s2558_s10 = inlined_call_operand.vmem [shape: f32[32,8], index: 10, kind: input, shape index: {}]   ;;  %s2559_s11 = inlined_call_operand.vmem [shape: f32[1,8], index: 11, kind: input, shape index: {}]   ;;  %s2560_s12 = inlined_call_operand.hbm [shape: f32[2,8], index: 12, kind: output, shape index: {}]  }
   0x1   :  { %18 = vsyncpa [#allocation6], 0 }
   0x2   :  { %19 = vsyncpa [#allocation4], 0  ;;  %s1846_s21 = smov [#allocation5]   ;;  %s1847_s23 = smov [#allocation2]  }
   0x3   :  { %s40_s22 = sshll.u32 %s1846_s21, 4  ;;  %s27_s24 = sshll.u32 %s1847_s23, 4  ;;  %s41_s22 = int_to_ptr.vmem [resolvable:$true] %s40_s22  ;;  %s28_s24 = int_to_ptr.vmem [resolvable:$true] %s27_s24 }
   0x4   :  { %s1768_s25 = scalar_lea.vmem %s41_s22, 96  ;;  %p1773_p1 = scmp.lt.s32.totalorder %s41_s22, %s41_s22 }
   0x5   :  { %p1769_p0 = scmp.ne.s32.totalorder %s41_s22, %s1768_s25  ;;  %p1774_p2 = scmp.lt.s32.totalorder %s1768_s25, %s1768_s25 }
   0x7   :  { %p1775_p3 = por %p1774_p2, %p1773_p1 }
   0x9   :  { %p1776_p4 = pnand %p1775_p3, %p1769_p0 }
   0xb   :  { %1779 = shalt.err (!%p1776_p4)
}
   0xc   :  { %43 = dma.hbm_to_vmem [thread:$0]  %s2550_s2, 96, %s41_s22, [#allocation6]  }
   0xd   :  { %s1788_s28 = scalar_lea.vmem %s28_s24, 256  ;;  %p1793_p6 = scmp.lt.s32.totalorder %s28_s24, %s28_s24 }
   0xe   :  { %p1789_p5 = scmp.ne.s32.totalorder %s28_s24, %s1788_s28  ;;  %p1794_p7 = scmp.lt.s32.totalorder %s1788_s28, %s1788_s28 }
  0x10   :  { %p1795_p8 = por %p1794_p7, %p1793_p6 }
  0x12   :  { %p1796_p9 = pnand %p1795_p8, %p1789_p5 }
  0x14   :  { %1799 = shalt.err (!%p1796_p9)
}
  0x15   :  { %s1848_s29 = smov 128   ;;  %s1849_s30 = smov 8  }
  0x16   :  { %33 = dma.hbm_to_vmem [thread:$0]  %s2549_s1, 256, %s28_s24, [#allocation3], %s1848_s29, %s1848_s29, %s1849_s30  }
  0x17   :  { %s1850_s15 = smov [#allocation7]  }
  0x18   :  { %s54_s16 = sshll.u32 %s1850_s15, 4  ;;  %s55_s16 = int_to_ptr.vmem [resolvable:$true] %s54_s16 }
  0x19   :  { %s1808_s17 = scalar_lea.vmem %s55_s16, 16  ;;  %s1812_s18 = scalar_lea.vmem %s55_s16, 32 }
  0x1a   :  { %p1809_p10 = scmp.ne.s32.totalorder %s55_s16, %s1808_s17  ;;  %p1813_p11 = scmp.lt.s32.totalorder %s55_s16, %s55_s16 }
  0x1b   :  { %p1814_p12 = scmp.lt.s32.totalorder %s1812_s18, %s1808_s17 }
  0x1d   :  { %p1815_p13 = por %p1814_p12, %p1813_p11 }
  0x1f   :  { %p1816_p0 = pnand %p1815_p13, %p1809_p10 }
  0x21   :  { %1819 = shalt.err (!%p1816_p0)
}
  0x22   :  { %57 = dma.hbm_to_vmem [thread:$0]  %s2553_s5, 16, %s55_s16, [#allocation6]  }
  0x23   :  { %1840 = dma.done.wait [#allocation3], 256  }
  0x24   :  { %1841 = vsyncadd [#allocation3], 4294967040 }
  0x25   :  { %1842 = dma.done.wait [#allocation6], 112  }
  0x26   :  { %1843 = vsyncadd [#allocation6], 4294967184  ;;  %v80_v0 = vld [vmem:[%s2548_s0 + $0x8] sm:$0x77]  ;;  %v79_v1 = vld [vmem:[%s2548_s0] sm:$0x77]  ;;  %v108_v4 = vlaneseq }
  0x27   :  { %s1851_s23 = smov 17   ;;  %v84_v2 = vcombine.high %v80_v0, %v80_v0  ;;  %v83_v3 = vcombine.high %v79_v1, %v79_v1  ;;  %v130_v7 = vld [vmem:[#allocation5 + $0x1] ss:$2 sm:$0x7]  ;;  %vm93_vm0 = vcmask 138240   ;;  %s1852_s0 = smov 94  }
  0x28   :  { %89 = vrot.lane.b32.xlu1 %v80_v0, %s1851_s23  ;;  %85 = vrot.lane.b32.xlu0 %v79_v1, %s1851_s23  ;;  %v1945_v5 = vshrl.u32 %v108_v4, 7  ;;  %s1853_s5 = smov 95   ;;  %s1854_s24 = smov 111   ;;  %v106_v31 = vld [vmem:[#allocation5] ss:$2 sm:$0x7] }
  0x29   :  { %s1855_s25 = smov 110   ;;  %s1856_s26 = smov 96   ;;  %vm370_vm1 = vcmask 769024   ;;  %vm375_vm2 = vcmask 1042432   ;;  %vm295_vm3 = vcmask 900096   ;;  %vm322_vm4 = vcmask 785408  }
  0x2a   :  { %v1948_v6 = vsub.s32 0, %v1945_v5  ;;  %v118_v16 = vsub.s32 2, %v1945_v5  ;;  %v1965_v18 = vsub.s32 1, %v1945_v5  ;;  %s1857_s27 = smov 126   ;;  %s1858_s28 = smov 112   ;;  %vm349_vm5 = vcmask 777216  }
  0x2b   :  { %s1859_s29 = smov 127   ;;  %vm400_vm6 = vcmask 1041408   ;;  %vm405_vm7 = vcmask 1044480   ;;  %vm175_vm8 = vcmask 1039360   ;;  %vm208_vm9 = vcmask 1031168   ;;  %s1863_s16 = smov [#allocation8]  }
  0x2c   :  { %91 = vrot.lane.b32.xlu1 %v84_v2, %s1851_s23  ;;  %87 = vrot.lane.b32.xlu0 %v83_v3, %s1851_s23  ;;  %v135_v8 = vrot.slane %v130_v7, %v1948_v6  ;;  %v143_v20 = vrot.slane %v130_v7, %v118_v16  ;;  %v139_v24 = vrot.slane %v130_v7, %v1965_v18  ;;  %vm241_vm10 = vcmask 916480   ;;  %s1644_s17 = sshll.u32 %s1863_s16, 4  ;;  %s1645_s17 = int_to_ptr.vmem [resolvable:$true] %s1644_s17 }
  0x2d   :  { %v111_v34 = vrot.slane %v106_v31, %v1948_v6  ;;  %v119_v59 = vrot.slane %v106_v31, %v118_v16  ;;  %v115_v60 = vrot.slane %v106_v31, %v1965_v18  ;;  %vm268_vm11 = vcmask 908288   ;;  %p1825_p2 = scmp.lt.s32.totalorder %s1645_s17, %s1645_s17 }
  0x2e   :  { %vm385_vm12 = vcmask 1040384   ;;  %vm390_vm13 = vcmask 1043456   ;;  %vm395_vm14 = vcmask 1046528   ;;  %vm380_vm15 = vcmask 1045504  }
  0x9a   :  { %v90_v9 = vpop.permute.xlu1 %89  ;;  %v86_v10 = vpop.permute.xlu0 %85 }
  0x9b   :  { %v1952_v11 = vsel %vm93_vm0, 0.0, %v90_v9  ;;  %v1955_v12 = vsel %vm93_vm0, 0.0, %v86_v10 }
  0x9c   :  { %v150_v13 = vmul.f32 %v135_v8, %v1952_v11  ;;  %v147_v14 = vmul.f32 %v135_v8, %v1955_v12  ;;  %v334_v15 = vrot.slane %v1952_v11, 3  ;;  %v331_v17 = vrot.slane %v1955_v12, 3 }
  0x9d   :  { %v253_v22 = vrot.slane %v1952_v11, 4  ;;  %v250_v23 = vrot.slane %v1955_v12, 4  ;;  %v2010_v37 = vmul.f32 %v111_v34, %v1952_v11  ;;  %v2013_v38 = vmul.f32 %v111_v34, %v1955_v12 }
  0x9e   :  { %364 = vrot.lane.b32.xlu1 %v150_v13, %s1852_s0  ;;  %358 = vrot.lane.b32.xlu0 %v147_v14, %s1852_s0  ;;  %v88_v19 = vpop.permute.xlu0 %87  ;;  %v92_v26 = vpop.permute.xlu1 %91  ;;  %v280_v35 = vrot.slane %v150_v13, 1  ;;  %v277_v36 = vrot.slane %v147_v14, 1  ;;  %v193_v45 = vrot.slane %v150_v13, 2  ;;  %v190_v46 = vrot.slane %v147_v14, 2 }
  0x9f   :  { %v1972_v21 = vsel %vm93_vm0, %v88_v19, 0.0  ;;  %v1978_v25 = vsel %vm93_vm0, %v86_v10, %v88_v19  ;;  %v1986_v28 = vsel %vm93_vm0, %v92_v26, 0.0  ;;  %v1992_v30 = vsel %vm93_vm0, %v90_v9, %v92_v26 }
  0xa0   :  { %v1983_v27 = vmul.f32 %v143_v20, %v1972_v21  ;;  %v1989_v29 = vmul.f32 %v139_v24, %v1978_v25  ;;  %v1999_v32 = vmul.f32 %v143_v20, %v1986_v28  ;;  %v2002_v33 = vmul.f32 %v139_v24, %v1992_v30  ;;  %v2099_v24 = vld [vmem:[%s2552_s4] sm:$0x1] }
  0xa1   :  { %v307_v39 = vrot.slane %v2010_v37, 6  ;;  %v304_v40 = vrot.slane %v2013_v38, 6  ;;  %v333_v41 = vrot.slane %v1972_v21, 3  ;;  %v332_v42 = vrot.slane %v1978_v25, 3 }
  0xa2   :  { %343 = vrot.lane.b32.xlu1 %v334_v15, %s1853_s5  ;;  %337 = vrot.lane.b32.xlu0 %v331_v17, %s1853_s5  ;;  %v336_v43 = vrot.slane %v1986_v28, 3  ;;  %v335_v44 = vrot.slane %v1992_v30, 3  ;;  %v226_v47 = vrot.slane %v2010_v37, 7  ;;  %v223_v48 = vrot.slane %v2013_v38, 7 }
  0xa3   :  { %v252_v49 = vrot.slane %v1972_v21, 4  ;;  %v251_v50 = vrot.slane %v1978_v25, 4  ;;  %v255_v51 = vrot.slane %v1986_v28, 4  ;;  %v254_v52 = vrot.slane %v1992_v30, 4 }
  0xa4   :  { %v159_v53 = vrot.slane %v1972_v21, 5  ;;  %v158_v54 = vrot.slane %v1978_v25, 5  ;;  %v162_v55 = vrot.slane %v1986_v28, 5  ;;  %v161_v56 = vrot.slane %v1992_v30, 5 }
  0xa5   :  { %v279_v57 = vrot.slane %v1983_v27, 1  ;;  %v278_v58 = vrot.slane %v1989_v29, 1  ;;  %v282_v61 = vrot.slane %v1999_v32, 1  ;;  %v281_v62 = vrot.slane %v2002_v33, 1 }
  0xa6   :  { %262 = vrot.lane.b32.xlu1 %v253_v22, %s1854_s24  ;;  %256 = vrot.lane.b32.xlu0 %v250_v23, %s1854_s24  ;;  %v125_v63 = vmul.f32 %v119_v59, %v1972_v21  ;;  %v2062_v0 = vmul.f32 %v115_v60, %v1978_v25  ;;  %v128_v3 = vmul.f32 %v119_v59, %v1986_v28  ;;  %v192_v10 = vrot.slane %v1983_v27, 2 }
  0xa7   :  { %v2069_v7 = vmul.f32 %v115_v60, %v1992_v30  ;;  %v191_v13 = vrot.slane %v1989_v29, 2  ;;  %v195_v14 = vrot.slane %v1999_v32, 2  ;;  %v194_v15 = vrot.slane %v2002_v33, 2 }
  0xa8   :  { %v306_v1 = vrot.slane %v125_v63, 6  ;;  %v305_v2 = vrot.slane %v2062_v0, 6  ;;  %v309_v8 = vrot.slane %v128_v3, 6  ;;  %v225_v16 = vrot.slane %v125_v63, 7 }
  0xa9   :  { %v308_v9 = vrot.slane %v2069_v7, 6  ;;  %v224_v17 = vrot.slane %v2062_v0, 7  ;;  %v1860_v19 = vmov 0.0   ;;  %v228_v20 = vrot.slane %v128_v3, 7 }
  0xaa   :  { %362 = vrot.lane.b32.xlu1 %v1983_v27, %s1852_s0  ;;  %360 = vrot.lane.b32.xlu0 %v1989_v29, %s1852_s0  ;;  %v227_v21 = vrot.slane %v2069_v7, 7  ;;  %v160_v22 = vrot.slane %v1952_v11, 5  ;;  %v157_v23 = vrot.slane %v1955_v12, 5  ;;  %v2102_v25 = vmul.f32 256.0, %v2099_v24 }
  0xab   :  { %495 = vmatprep.mubr.f32.mxu0 %v1860_v19  ;;  %588 = vmatprep.mubr.f32.mxu1 %v1860_v19  ;;  %vm414_vm0 = vcmask 220160  }
  0xac   :  { %v683_v26 = vrot.slane %v2102_v25, %v1948_v6 }
  0xae   :  { %368 = vrot.lane.b32.xlu1 %v1999_v32, %s1852_s0  ;;  %366 = vrot.lane.b32.xlu0 %v2002_v33, %s1852_s0 }
  0xb2   :  { %289 = vrot.lane.b32.xlu1 %v280_v35, %s1855_s25  ;;  %283 = vrot.lane.b32.xlu0 %v277_v36, %s1855_s25 }
  0xb6   :  { %316 = vrot.lane.b32.xlu1 %v307_v39, %s1856_s26  ;;  %310 = vrot.lane.b32.xlu0 %v304_v40, %s1856_s26 }
  0xba   :  { %341 = vrot.lane.b32.xlu1 %v333_v41, %s1853_s5  ;;  %339 = vrot.lane.b32.xlu0 %v332_v42, %s1853_s5 }
  0xbe   :  { %347 = vrot.lane.b32.xlu1 %v336_v43, %s1853_s5  ;;  %345 = vrot.lane.b32.xlu0 %v335_v44, %s1853_s5 }
  0xc2   :  { %202 = vrot.lane.b32.xlu1 %v193_v45, %s1857_s27  ;;  %196 = vrot.lane.b32.xlu0 %v190_v46, %s1857_s27 }
  0xc6   :  { %235 = vrot.lane.b32.xlu1 %v226_v47, %s1858_s28  ;;  %229 = vrot.lane.b32.xlu0 %v223_v48, %s1858_s28 }
  0xca   :  { %260 = vrot.lane.b32.xlu1 %v252_v49, %s1854_s24  ;;  %258 = vrot.lane.b32.xlu0 %v251_v50, %s1854_s24 }
  0xce   :  { %266 = vrot.lane.b32.xlu1 %v255_v51, %s1854_s24  ;;  %264 = vrot.lane.b32.xlu0 %v254_v52, %s1854_s24 }
  0xd2   :  { %167 = vrot.lane.b32.xlu1 %v159_v53, %s1859_s29  ;;  %165 = vrot.lane.b32.xlu0 %v158_v54, %s1859_s29 }
  0xd6   :  { %173 = vrot.lane.b32.xlu1 %v162_v55, %s1859_s29  ;;  %171 = vrot.lane.b32.xlu0 %v161_v56, %s1859_s29 }
  0xda   :  { %287 = vrot.lane.b32.xlu1 %v279_v57, %s1855_s25  ;;  %285 = vrot.lane.b32.xlu0 %v278_v58, %s1855_s25 }
  0xde   :  { %293 = vrot.lane.b32.xlu1 %v282_v61, %s1855_s25  ;;  %291 = vrot.lane.b32.xlu0 %v281_v62, %s1855_s25 }
  0xe2   :  { %314 = vrot.lane.b32.xlu1 %v306_v1, %s1856_s26  ;;  %312 = vrot.lane.b32.xlu0 %v305_v2, %s1856_s26 }
  0xe6   :  { %320 = vrot.lane.b32.xlu1 %v309_v8, %s1856_s26  ;;  %318 = vrot.lane.b32.xlu0 %v308_v9, %s1856_s26 }
  0xea   :  { %200 = vrot.lane.b32.xlu1 %v192_v10, %s1857_s27  ;;  %198 = vrot.lane.b32.xlu0 %v191_v13, %s1857_s27 }
  0xee   :  { %206 = vrot.lane.b32.xlu1 %v195_v14, %s1857_s27  ;;  %204 = vrot.lane.b32.xlu0 %v194_v15, %s1857_s27 }
  0xf2   :  { %233 = vrot.lane.b32.xlu1 %v225_v16, %s1858_s28  ;;  %231 = vrot.lane.b32.xlu0 %v224_v17, %s1858_s28 }
  0xf6   :  { %239 = vrot.lane.b32.xlu1 %v228_v20, %s1858_s28  ;;  %237 = vrot.lane.b32.xlu0 %v227_v21, %s1858_s28 }
  0xfa   :  { %169 = vrot.lane.b32.xlu1 %v160_v22, %s1859_s29  ;;  %163 = vrot.lane.b32.xlu0 %v157_v23, %s1859_s29 }
  0xfe   :  { %685 = vbcast.lane.b32.xlu1 %v683_v26, 256  ;;  %689 = vbcast.lane.b32.xlu0 %v683_v26, 264 }
 0x102   :  { %697 = vbcast.lane.b32.xlu1 %v683_v26, 280  ;;  %693 = vbcast.lane.b32.xlu0 %v683_v26, 272 }
 0x110   :  { %v365_v11 = vpop.permute.xlu1 %364  ;;  %v359_v12 = vpop.permute.xlu0 %358 }
 0x114   :  { %v2106_v27 = vpop.permute.xlu1 %343  ;;  %v338_v28 = vpop.permute.xlu0 %337 }
 0x118   :  { %v2108_v29 = vpop.permute.xlu1 %262  ;;  %v2110_v30 = vpop.permute.xlu0 %256 }
 0x11c   :  { %v363_v31 = vpop.permute.xlu1 %362  ;;  %v361_v32 = vpop.permute.xlu0 %360 }
 0x11d   :  { %v372_v33 = vsel %vm370_vm1, %v361_v32, %v363_v31  ;;  %v371_v34 = vsel %vm370_vm1, %v359_v12, %v361_v32 }
 0x11e   :  { %1654 = vmatprep.subr.msk.mxu0 %vm375_vm2, %v372_v33 }
 0x11f   :  { %1655 = vmatpush1.msk.msra.mxu0 %vm375_vm2, %v371_v34 }
 0x120   :  { %v369_v35 = vpop.permute.xlu1 %368  ;;  %v367_v36 = vpop.permute.xlu0 %366 }
 0x121   :  { %v374_v39 = vsel %vm370_vm1, %v367_v36, %v369_v35  ;;  %v373_v40 = vsel %vm370_vm1, %v365_v11, %v367_v36  ;;  %vm737_vm1 = vcmask 130112  }
 0x122   :  { %1660 = vmatprep.subr.msk.mxu1 %vm375_vm2, %v374_v39 }
 0x123   :  { %1661 = vmatpush1.msk.msra.mxu1 %vm375_vm2, %v373_v40 }
 0x124   :  { %v290_v41 = vpop.permute.xlu1 %289  ;;  %v284_v42 = vpop.permute.xlu0 %283 }
 0x128   :  { %v317_v43 = vpop.permute.xlu1 %316  ;;  %v311_v44 = vpop.permute.xlu0 %310 }
 0x12c   :  { %v342_v45 = vpop.permute.xlu1 %341  ;;  %v340_v46 = vpop.permute.xlu0 %339 }
 0x12d   :  { %v350_v14 = vsel %vm349_vm5, %v338_v28, %v340_v46  ;;  %v351_v15 = vsel %vm349_vm5, %v340_v46, %v342_v45 }
 0x130   :  { %v348_v47 = vpop.permute.xlu1 %347  ;;  %v346_v48 = vpop.permute.xlu0 %345 }
 0x131   :  { %v352_v31 = vsel %vm349_vm5, %v2106_v27, %v346_v48  ;;  %v353_v32 = vsel %vm349_vm5, %v346_v48, %v348_v47  ;;  %vm1862_vm5 = vmmov 0  }
 0x134   :  { %v2116_v49 = vpop.permute.xlu1 %202  ;;  %v2118_v50 = vpop.permute.xlu0 %196 }
 0x138   :  { %v2120_v51 = vpop.permute.xlu1 %235  ;;  %v2122_v52 = vpop.permute.xlu0 %229 }
 0x13c   :  { %v2124_v53 = vpop.permute.xlu1 %260  ;;  %v2126_v54 = vpop.permute.xlu0 %258 }
 0x140   :  { %v2128_v55 = vpop.permute.xlu1 %266  ;;  %v2130_v56 = vpop.permute.xlu0 %264 }
 0x144   :  { %v168_v57 = vpop.permute.xlu1 %167  ;;  %v2132_v58 = vpop.permute.xlu0 %165 }
 0x145   :  { %v177_v27 = vsel %vm175_vm8, %v2132_v58, %v168_v57  ;;  %v270_v57 = vsel %vm268_vm11, %v2126_v54, %v2124_v53 }
 0x148   :  { %v2134_v59 = vpop.permute.xlu1 %173  ;;  %v2136_v60 = vpop.permute.xlu0 %171 }
 0x14c   :  { %v288_v61 = vpop.permute.xlu1 %287  ;;  %v286_v62 = vpop.permute.xlu0 %285 }
 0x14d   :  { %v296_v8 = vsel %vm295_vm3, %v284_v42, %v286_v62  ;;  %v297_v9 = vsel %vm295_vm3, %v286_v62, %v288_v61  ;;  %v269_v61 = vsel %vm268_vm11, %v2110_v30, %v2126_v54  ;;  %v272_v30 = vsel %vm268_vm11, %v2130_v56, %v2128_v55 }
 0x14e   :  { %v179_v55 = vsel %vm175_vm8, %v2136_v60, %v2134_v59 }
 0x150   :  { %v294_v63 = vpop.permute.xlu1 %293  ;;  %v292_v1 = vpop.permute.xlu0 %291 }
 0x151   :  { %v298_v26 = vsel %vm295_vm3, %v290_v41, %v292_v1  ;;  %v299_v11 = vsel %vm295_vm3, %v292_v1, %v294_v63  ;;  %vm751_vm3 = vcmask 261312  }
 0x154   :  { %v315_v2 = vpop.permute.xlu1 %314  ;;  %v313_v3 = vpop.permute.xlu0 %312 }
 0x155   :  { %v323_v10 = vsel %vm322_vm4, %v311_v44, %v313_v3  ;;  %v324_v13 = vsel %vm322_vm4, %v313_v3, %v315_v2 }
 0x156   :  { %v402_v16 = vsel %vm400_vm6, %v297_v9, %v324_v13  ;;  %v401_v17 = vsel %vm400_vm6, %v296_v8, %v323_v10  ;;  %v377_v10 = vsel %vm375_vm2, %v2062_v0, %v177_v27 }
 0x157   :  { %v407_v20 = vsel %vm405_vm7, %v402_v16, %v351_v15  ;;  %v406_v21 = vsel %vm405_vm7, %v401_v17, %v350_v14 }
 0x158   :  { %v321_v22 = vpop.permute.xlu1 %320  ;;  %457 = vmatprep.subr.mxu0 %v407_v20  ;;  %v319_v23 = vpop.permute.xlu0 %318 }
 0x159   :  { %v325_v12 = vsel %vm322_vm4, %v317_v43, %v319_v23  ;;  %v326_v28 = vsel %vm322_vm4, %v319_v23, %v321_v22  ;;  %458 = vmatpush1.msra.mxu0 %v406_v21  ;;  %v379_v22 = vsel %vm375_vm2, %v2069_v7, %v179_v55  ;;  %v413_v7 = vld [vmem:[%s2551_s3 + $0x18] sm:$0xff]  ;;  %vm772_vm4 = vcmask 1041409  }
 0x15a   :  { %v404_v33 = vsel %vm400_vm6, %v299_v11, %v326_v28  ;;  %v403_v34 = vsel %vm400_vm6, %v298_v26, %v325_v12  ;;  %vm939_vm6 = vcmask 261120  }
 0x15b   :  { %v409_v35 = vsel %vm405_vm7, %v404_v33, %v353_v32  ;;  %v408_v36 = vsel %vm405_vm7, %v403_v34, %v352_v31  ;;  %vm1413_vm7 = vcmask 31744  }
 0x15c   :  { %v201_v39 = vpop.permute.xlu1 %200  ;;  %550 = vmatprep.subr.mxu1 %v409_v35  ;;  %v199_v40 = vpop.permute.xlu0 %198 }
 0x15d   :  { %551 = vmatpush1.msra.mxu1 %v408_v36  ;;  %v209_v45 = vsel %vm208_vm9, %v2118_v50, %v199_v40  ;;  %v210_v46 = vsel %vm208_vm9, %v199_v40, %v201_v39  ;;  %v271_v50 = vsel %vm268_vm11, %v2108_v29, %v2130_v56 }
 0x15e   :  { %v382_v0 = vsel %vm380_vm15, %v377_v10, %v210_v46 }
 0x160   :  { %v207_v41 = vpop.permute.xlu1 %206  ;;  %v205_v42 = vpop.permute.xlu0 %204 }
 0x161   :  { %v211_v29 = vsel %vm208_vm9, %v2116_v49, %v205_v42  ;;  %v212_v13 = vsel %vm208_vm9, %v205_v42, %v207_v41 }
 0x162   :  { %v384_v23 = vsel %vm380_vm15, %v379_v22, %v212_v13 }
 0x164   :  { %v234_v43 = vpop.permute.xlu1 %233  ;;  %v232_v44 = vpop.permute.xlu0 %231 }
 0x165   :  { %v242_v47 = vsel %vm241_vm10, %v2122_v52, %v232_v44  ;;  %v243_v48 = vsel %vm241_vm10, %v232_v44, %v234_v43 }
 0x166   :  { %v386_v62 = vsel %vm385_vm12, %v209_v45, %v242_v47  ;;  %v387_v63 = vsel %vm385_vm12, %v210_v46, %v243_v48 }
 0x167   :  { %v392_v52 = vsel %vm390_vm13, %v387_v63, %v270_v57  ;;  %v391_v1 = vsel %vm390_vm13, %v386_v62, %v269_v61 }
 0x168   :  { %v240_v2 = vpop.permute.xlu1 %239  ;;  %v238_v3 = vpop.permute.xlu0 %237  ;;  %v397_v53 = vsel %vm395_vm14, %v392_v52, %v297_v9  ;;  %v396_v54 = vsel %vm395_vm14, %v391_v1, %v296_v8 }
 0x169   :  { %v244_v14 = vsel %vm241_vm10, %v2120_v51, %v238_v3  ;;  %v245_v15 = vsel %vm241_vm10, %v238_v3, %v240_v2  ;;  %459 = vmatprep.subr.mxu0 %v397_v53 }
 0x16a   :  { %v388_v56 = vsel %vm385_vm12, %v211_v29, %v244_v14  ;;  %v389_v8 = vsel %vm385_vm12, %v212_v13, %v245_v15  ;;  %460 = vmatpush1.msra.mxu0 %v396_v54 }
 0x16b   :  { %461 = vmatprep.subr.mxu0 %v382_v0  ;;  %v394_v49 = vsel %vm390_vm13, %v389_v8, %v272_v30  ;;  %v393_v9 = vsel %vm390_vm13, %v388_v56, %v271_v50 }
 0x16c   :  { %v170_v51 = vpop.permute.xlu1 %169  ;;  %v164_v16 = vpop.permute.xlu0 %163  ;;  %v399_v17 = vsel %vm395_vm14, %v394_v49, %v299_v11  ;;  %v398_v20 = vsel %vm395_vm14, %v393_v9, %v298_v26 }
 0x16d   :  { %v178_v59 = vsel %vm175_vm8, %v170_v51, %v2136_v60  ;;  %v176_v21 = vsel %vm175_vm8, %v164_v16, %v2132_v58  ;;  %552 = vmatprep.subr.mxu1 %v399_v17  ;;  %v410_v60 = vld [vmem:[%s2551_s3] sm:$0xff]  ;;  %v831_v16 = vmul.f32 %v2102_v25, %v2099_v24 }
 0x16e   :  { %553 = vmatpush1.msra.mxu1 %v398_v20  ;;  %v376_v12 = vsel %vm375_vm2, %v2013_v38, %v176_v21  ;;  %v378_v11 = vsel %vm375_vm2, %v2010_v37, %v178_v59  ;;  %v411_v37 = vld [vmem:[%s2551_s3 + $0x8] sm:$0xff]  ;;  %v412_v38 = vld [vmem:[%s2551_s3 + $0x10] sm:$0xff]  ;;  %v1861_v20 = vmov 0   ;;  %vm744_vm2 = vcmask 195712  }
 0x16f   :  { %554 = vmatprep.subr.mxu1 %v384_v23  ;;  %v381_v58 = vsel %vm380_vm15, %v376_v12, %v209_v45  ;;  %v383_v26 = vsel %vm380_vm15, %v378_v11, %v211_v29  ;;  %v2319_v17 = vrot.slane %v831_v16, %v1948_v6  ;;  %1748 = vset.pattern.permute.xlu0 %v1861_v20 }
 0x170   :  { %462 = vmatpush1.msra.mxu0 %v381_v58  ;;  %555 = vmatpush1.msra.mxu1 %v383_v26  ;;  %v2331_v11 = vpop.permute.xlu0 %689 }
 0x171   :  { %1656 = vmatmul.mubr.msk.f32.vlgmr.msra.gmra.mxu0 %vm414_vm0, %v410_v60  ;;  %1662 = vmatmul.mubr.msk.f32.vlgmr.msra.gmra.mxu1 %vm414_vm0, %v410_v60  ;;  %v2333_v60 = vpop.permute.xlu1 %685 }
 0x172   :  { %594 = vmatprep.mubr.f32.mxu1 %v1860_v19  ;;  %501 = vmatprep.mubr.f32.mxu0 %v1860_v19 }
 0x173   :  { %1692 = vmatprep.subr.mxu0 %v1860_v19  ;;  %1703 = vmatprep.subr.mxu1 %v1860_v19 }
 0x174   :  { %1749 = vset.pattern.permute.xlu1 %v1861_v20  ;;  %v2335_v58 = vpop.permute.xlu0 %693 }
 0x175   :  { %1663 = vmatmul.mubr.msk.f32.gmra.mxu1 %vm414_vm0, %v411_v37  ;;  %1657 = vmatmul.mubr.msk.f32.gmra.mxu0 %vm414_vm0, %v411_v37  ;;  %v2337_v26 = vpop.permute.xlu1 %697 }
 0x176   :  { %507 = vmatprep.mubr.f32.mxu0 %v1860_v19  ;;  %600 = vmatprep.mubr.f32.mxu1 %v1860_v19 }
 0x179   :  { %1658 = vmatmul.mubr.msk.f32.gmra.mxu0 %vm414_vm0, %v412_v38  ;;  %1664 = vmatmul.mubr.msk.f32.gmra.mxu1 %vm414_vm0, %v412_v38 }
 0x17a   :  { %513 = vmatprep.mubr.f32.mxu0 %v1860_v19  ;;  %606 = vmatprep.mubr.f32.mxu1 %v1860_v19 }
 0x17d   :  { %1659 = vmatmul.mubr.msk.f32.gmra.mxu0 %vm414_vm0, %v413_v7  ;;  %1665 = vmatmul.mubr.msk.f32.gmra.mxu1 %vm414_vm0, %v413_v7 }
 0x17e   :  { %1700 = vmatprep.mubr.msk.f32.mxu0 %vm1862_vm5, %v1860_v19  ;;  %1711 = vmatprep.mubr.msk.f32.mxu1 %vm1862_vm5, %v1860_v19 }
 0x231   :  { %v2244_v28 = vpop.f32.mrf.mxu0  ;;  %v2246_v31 = vpop.f32.mrf.mxu1 }
 0x232   :  { %v638_v35 = vmul.f32 %v2244_v28, %v2244_v28  ;;  %v646_v42 = vmul.f32 %v2246_v31, %v2246_v31 }
 0x233   :  { %v2248_v32 = vpop.f32.mrf.mxu0  ;;  %v2250_v33 = vpop.f32.mrf.mxu1 }
 0x234   :  { %v614_v34 = vadd.f32 %v2248_v32, %v2244_v28  ;;  %v639_v36 = vmul.f32 %v2248_v32, %v2248_v32  ;;  %v647_v27 = vmul.f32 %v2250_v33, %v2250_v33  ;;  %v626_v44 = vadd.f32 %v2250_v33, %v2246_v31 }
 0x235   :  { %v2258_v39 = vpop.f32.mrf.mxu1  ;;  %v2260_v40 = vpop.f32.mrf.mxu0 }
 0x236   :  { %615 = vadd.xlane.f32.xlu0 %v614_v34  ;;  %v654_v41 = vadd.f32 %v639_v36, %v638_v35  ;;  %v666_v47 = vadd.f32 %v647_v27, %v646_v42  ;;  %v640_v61 = vmul.f32 %v2260_v40, %v2260_v40  ;;  %v648_v50 = vmul.f32 %v2258_v39, %v2258_v39 }
 0x237   :  { %v2266_v43 = vpop.f32.mrf.mxu0  ;;  %v2270_v45 = vpop.f32.mrf.mxu1  ;;  %v727_v27 = vand.u32 127, %v108_v4 }
 0x238   :  { %655 = vadd.xlane.f32.xlu1 %v654_v41  ;;  %v629_v48 = vadd.f32 %v2270_v45, %v2258_v39  ;;  %v641_v57 = vmul.f32 %v2266_v43, %v2266_v43  ;;  %v617_v63 = vadd.f32 %v2266_v43, %v2260_v40  ;;  %v649_v52 = vmul.f32 %v2270_v45, %v2270_v45 }
 0x239   :  { %v2272_v46 = vpop.f32.mrf.mxu0  ;;  %v2294_v53 = vpop.f32.mrf.mxu1 }
 0x23a   :  { %627 = vadd.xlane.f32.xlu0 %v626_v44  ;;  %v657_v1 = vadd.f32 %v641_v57, %v640_v61  ;;  %v642_v2 = vmul.f32 %v2272_v46, %v2272_v46  ;;  %v669_v10 = vadd.f32 %v649_v52, %v648_v50  ;;  %v650_v56 = vmul.f32 %v2294_v53, %v2294_v53 }
 0x23b   :  { %v2280_v62 = vpop.f32.mrf.mxu0  ;;  %v2298_v13 = vpop.f32.mrf.mxu1  ;;  %v746_v57 = vadd.s32 4294967272, %v727_v27 }
 0x23c   :  { %667 = vadd.xlane.f32.xlu1 %v666_v47  ;;  %v620_v30 = vadd.f32 %v2280_v62, %v2272_v46  ;;  %v643_v3 = vmul.f32 %v2280_v62, %v2280_v62  ;;  %v632_v15 = vadd.f32 %v2298_v13, %v2294_v53  ;;  %v651_v8 = vmul.f32 %v2298_v13, %v2298_v13 }
 0x23d   :  { %v2296_v54 = vpop.f32.mrf.mxu0  ;;  %v2310_v0 = vpop.f32.mrf.mxu1  ;;  %v732_v47 = vadd.s32 4294967288, %v727_v27 }
 0x23e   :  { %630 = vadd.xlane.f32.xlu0 %v629_v48  ;;  %v660_v29 = vadd.f32 %v643_v3, %v642_v2  ;;  %v672_v49 = vadd.f32 %v651_v8, %v650_v56  ;;  %v644_v59 = vmul.f32 %v2296_v54, %v2296_v54  ;;  %v652_v25 = vmul.f32 %v2310_v0, %v2310_v0 }
 0x23f   :  { %v2300_v14 = vpop.f32.mrf.mxu0  ;;  %v2312_v9 = vpop.f32.mrf.mxu1  ;;  %v739_v48 = vadd.s32 4294967280, %v727_v27  ;;  %v2351_v50 = vsub.s32 %v732_v47, %v1945_v5 }
 0x240   :  { %618 = vadd.xlane.f32.xlu1 %v617_v63  ;;  %v623_v55 = vadd.f32 %v2300_v14, %v2296_v54  ;;  %v635_v51 = vadd.f32 %v2312_v9, %v2310_v0  ;;  %v645_v21 = vmul.f32 %v2300_v14, %v2300_v14  ;;  %v653_v23 = vmul.f32 %v2312_v9, %v2312_v9 }
 0x241   :  { %v2354_v52 = vsub.s32 %v739_v48, %v1945_v5 }
 0x242   :  { %658 = vadd.xlane.f32.xlu0 %v657_v1  ;;  %v663_v22 = vadd.f32 %v645_v21, %v644_v59  ;;  %v675_v12 = vadd.f32 %v653_v23, %v652_v25  ;;  %v2357_v1 = vsub.s32 %v727_v27, %v1945_v5 }
 0x244   :  { %621 = vadd.xlane.f32.xlu1 %v620_v30  ;;  %v2360_v30 = vsub.s32 %v746_v57, %v1945_v5 }
 0x246   :  { %670 = vadd.xlane.f32.xlu0 %v669_v10 }
 0x248   :  { %661 = vadd.xlane.f32.xlu1 %v660_v29  ;;  %v711_v29 = vmul.f32 2.0, %v2099_v24 }
 0x24a   :  { %633 = vadd.xlane.f32.xlu0 %v632_v15  ;;  %v716_v59 = vrot.slane %v711_v29, %v1948_v6 }
 0x24c   :  { %624 = vadd.xlane.f32.xlu1 %v623_v55 }
 0x24e   :  { %673 = vadd.xlane.f32.xlu0 %v672_v49 }
 0x252   :  { %636 = vadd.xlane.f32.xlu0 %v635_v51 }
 0x25d   :  { %842 = vbcast.lane.b32.xlu1 %v2319_v17, 264 }
 0x268   :  { %838 = vbcast.lane.b32.xlu0 %v2319_v17, 256 }
 0x281   :  { %664 = vadd.xlane.f32.xlu1 %v663_v22 }
 0x287   :  { %676 = vadd.xlane.f32.xlu0 %v675_v12 }
 0x2bf   :  { %v616_v37 = vpop.xlane.xlu0 %615 }
 0x2c0   :  { %v731_v56 = vrot.slane %v616_v37, %v2357_v1  ;;  %v703_v57 = vadd.f32 %v2333_v60, %v616_v37 }
 0x2c1   :  { %v2339_v38 = vpop.xlane.xlu1 %655 }
 0x2c3   :  { %v628_v7 = vpop.xlane.xlu0 %627 }
 0x2c4   :  { %v756_v8 = vrot.slane %v628_v7, %v2357_v1 }
 0x2c5   :  { %v2341_v34 = vpop.xlane.xlu1 %667 }
 0x2c7   :  { %v631_v35 = vpop.xlane.xlu0 %630 }
 0x2c8   :  { %v760_v3 = vrot.slane %v631_v35, %v2351_v50 }
 0x2c9   :  { %v619_v36 = vpop.xlane.xlu1 %618 }
 0x2ca   :  { %v736_v10 = vrot.slane %v619_v36, %v2351_v50  ;;  %v761_v51 = vsel %vm737_vm1, %v760_v3, %v756_v8  ;;  %v708_v3 = vadd.f32 %v2331_v11, %v631_v35  ;;  %v867_v35 = vld [vmem:[%s2555_s7 + $0x18] sm:$0xff] }
 0x2cb   :  { %v2343_v41 = vpop.xlane.xlu0 %658  ;;  %1693 = vmatpush3.msra.mxu0 %v867_v35  ;;  %1704 = vmatpush3.msra.mxu1 %v867_v35 }
 0x2cc   :  { %v738_v16 = vsel %vm737_vm1, %v736_v10, %v731_v56  ;;  %v704_v10 = vadd.f32 %v2331_v11, %v619_v36  ;;  %1694 = vmatprep.subr.mxu0 %v1860_v19  ;;  %1705 = vmatprep.subr.mxu1 %v1860_v19 }
 0x2cd   :  { %v622_v42 = vpop.xlane.xlu1 %621 }
 0x2ce   :  { %v743_v15 = vrot.slane %v622_v42, %v2354_v52  ;;  %v705_v37 = vadd.f32 %v2335_v58, %v622_v42 }
 0x2cf   :  { %v2346_v44 = vpop.xlane.xlu0 %670 }
 0x2d0   :  { %v745_v21 = vsel %vm744_vm2, %v743_v15, %v738_v16  ;;  %v707_v15 = vadd.f32 %v2333_v60, %v628_v7  ;;  %v865_v60 = vld [vmem:[%s2555_s7 + $0x8] sm:$0xff] }
 0x2d1   :  { %v2348_v61 = vpop.xlane.xlu1 %661 }
 0x2d3   :  { %v634_v63 = vpop.xlane.xlu0 %633 }
 0x2d4   :  { %v765_v55 = vrot.slane %v634_v63, %v2354_v52  ;;  %v709_v29 = vadd.f32 %v2335_v58, %v634_v63  ;;  %v864_v58 = vld [vmem:[%s2555_s7] sm:$0xff] }
 0x2d5   :  { %v625_v4 = vpop.xlane.xlu1 %624 }
 0x2d6   :  { %v750_v5 = vrot.slane %v625_v4, %v2360_v30  ;;  %v766_v22 = vsel %vm744_vm2, %v765_v55, %v761_v51  ;;  %v706_v11 = vadd.f32 %v2337_v26, %v625_v4 }
 0x2d7   :  { %v2362_v2 = vpop.xlane.xlu0 %673 }
 0x2d8   :  { %v752_v25 = vsel %vm751_vm3, %v750_v5, %v745_v21 }
 0x2db   :  { %v637_v49 = vpop.xlane.xlu0 %636 }
 0x2dc   :  { %v770_v20 = vrot.slane %v637_v49, %v2360_v30  ;;  %v710_v55 = vadd.f32 %v2337_v26, %v637_v49  ;;  %v843_v26 = vpop.permute.xlu1 %842 }
 0x2de   :  { %v771_v23 = vsel %vm751_vm3, %v770_v20, %v766_v22 }
 0x2df   :  { %v773_v12 = vsel %vm772_vm4, %v771_v23, %v752_v25  ;;  %v839_v7 = vpop.permute.xlu0 %838 }
 0x2e0   :  { %v775_v27 = vmul.f32 %v773_v12, %v716_v59 }
 0x2e2   :  { %v799_v47 = vrot.slane %v775_v27, %v1965_v18  ;;  %v780_v48 = vrot.slane %v775_v27, %v1948_v6 }
 0x2e4   :  { %801 = vbcast.lane.b32.xlu0 %v799_v47, 256  ;;  %782 = vbcast.lane.b32.xlu1 %v780_v48, 256 }
 0x2e8   :  { %809 = vbcast.lane.b32.xlu0 %v799_v47, 272  ;;  %786 = vbcast.lane.b32.xlu1 %v780_v48, 264 }
 0x2ec   :  { %794 = vbcast.lane.b32.xlu0 %v780_v48, 280  ;;  %805 = vbcast.lane.b32.xlu1 %v799_v47, 264 }
 0x2f0   :  { %846 = vbcast.lane.b32.xlu0 %v2319_v17, 272  ;;  %790 = vbcast.lane.b32.xlu1 %v780_v48, 272 }
 0x2f4   :  { %877 = vperm.xlu0 %1748, %v703_v57   ;;  %813 = vbcast.lane.b32.xlu1 %v799_v47, 280 }
 0x2f8   :  { %892 = vperm.xlu0 %1748, %v708_v3   ;;  %850 = vbcast.lane.b32.xlu1 %v2319_v17, 280  ;;  %v866_v17 = vld [vmem:[%s2555_s7 + $0x10] sm:$0xff] }
 0x2f9   :  { %1695 = vmatpush3.msra.mxu0 %v866_v17  ;;  %1706 = vmatpush3.msra.mxu1 %v866_v17 }
 0x2fa   :  { %1696 = vmatprep.subr.mxu0 %v1860_v19  ;;  %1707 = vmatprep.subr.mxu1 %v1860_v19 }
 0x2fb   :  { %1697 = vmatpush3.msra.mxu0 %v865_v60  ;;  %1708 = vmatpush3.msra.mxu1 %v865_v60 }
 0x2fc   :  { %895 = vperm.xlu0 %1748, %v709_v29   ;;  %880 = vperm.xlu1 %1749, %v704_v10  }
 0x2fd   :  { %1698 = vmatprep.subr.mxu0 %v1860_v19  ;;  %1709 = vmatprep.subr.mxu1 %v1860_v19 }
 0x2fe   :  { %1699 = vmatpush3.msra.mxu0 %v864_v58  ;;  %1710 = vmatpush3.msra.mxu1 %v864_v58 }
 0x2ff   :  { %1714 = vmatprep.subr.mxu0 %v1860_v19  ;;  %1719 = vmatprep.subr.mxu1 %v1860_v19 }
 0x300   :  { %898 = vperm.xlu0 %1748, %v710_v55   ;;  %889 = vperm.xlu1 %1749, %v707_v15  }
 0x304   :  { %883 = vperm.xlu1 %1749, %v705_v37  }
 0x308   :  { %886 = vperm.xlu1 %1749, %v706_v11  }
 0x30a   :  { %v665_v36 = vpop.xlane.xlu1 %664 }
 0x310   :  { %v677_v42 = vpop.xlane.xlu0 %676 }
 0x356   :  { %v783_v63 = vpop.permute.xlu1 %782  ;;  %v802_v4 = vpop.permute.xlu0 %801 }
 0x357   :  { %v823_v56 = vadd.f32 %v783_v63, %v2339_v38  ;;  %v827_v5 = vadd.f32 %v802_v4, %v2341_v34 }
 0x359   :  { %v856_v8 = vadd.f32 %v839_v7, %v823_v56  ;;  %v860_v20 = vadd.f32 %v839_v7, %v827_v5 }
 0x35a   :  { %v787_v49 = vpop.permute.xlu1 %786  ;;  %v810_v51 = vpop.permute.xlu0 %809 }
 0x35b   :  { %v824_v16 = vadd.f32 %v787_v49, %v2343_v41  ;;  %1021 = vperm.xlu1 %1749, %v856_v8   ;;  %v829_v38 = vadd.f32 %v810_v51, %v2362_v2 }
 0x35d   :  { %v857_v59 = vadd.f32 %v843_v26, %v824_v16 }
 0x35e   :  { %v806_v21 = vpop.permute.xlu1 %805  ;;  %v795_v22 = vpop.permute.xlu0 %794 }
 0x35f   :  { %v828_v25 = vadd.f32 %v806_v21, %v2346_v44  ;;  %1024 = vperm.xlu0 %1748, %v857_v59   ;;  %1033 = vperm.xlu1 %1749, %v860_v20   ;;  %v826_v57 = vadd.f32 %v795_v22, %v665_v36  ;;  %v1375_v59 = vld [vmem:[#allocation2 + $0x8] sm:$0xff]  ;;  %v1374_v21 = vld [vmem:[#allocation2] sm:$0xff] }
 0x360   :  { %v1379_v22 = vcombine.high %v1375_v59, %v1375_v59 }
 0x361   :  { %v861_v23 = vadd.f32 %v843_v26, %v828_v25  ;;  %v1387_v25 = vsel %vm390_vm13, %v1375_v59, 0.0 }
 0x362   :  { %v791_v12 = vpop.permute.xlu1 %790  ;;  %v847_v27 = vpop.permute.xlu0 %846 }
 0x363   :  { %v825_v34 = vadd.f32 %v791_v12, %v2348_v61  ;;  %1036 = vperm.xlu0 %1748, %v861_v23   ;;  %v862_v48 = vadd.f32 %v847_v27, %v829_v38  ;;  %v1378_v23 = vcombine.high %v1374_v21, %v1374_v21  ;;  %v1382_v12 = vsel %vm390_vm13, %v1374_v21, 0.0 }
 0x365   :  { %v858_v47 = vadd.f32 %v847_v27, %v825_v34  ;;  %v1388_v27 = vsel %vm390_vm13, %v1379_v22, 0.0  ;;  %v1383_v38 = vsel %vm390_vm13, %v1378_v23, 0.0 }
 0x366   :  { %v814_v41 = vpop.permute.xlu1 %813  ;;  %v1389_v34 = vadd.f32 %v1388_v27, %v1387_v25 }
 0x367   :  { %1039 = vperm.xlu0 %1748, %v862_v48   ;;  %1027 = vperm.xlu1 %1749, %v858_v47   ;;  %v830_v3 = vadd.f32 %v814_v41, %v677_v42  ;;  %v1384_v47 = vadd.f32 %v1383_v38, %v1382_v12 }
 0x36a   :  { %v851_v10 = vpop.permute.xlu1 %850 }
 0x36b   :  { %v859_v29 = vadd.f32 %v851_v10, %v826_v57  ;;  %v863_v44 = vadd.f32 %v851_v10, %v830_v3 }
 0x36d   :  { %1042 = vperm.xlu0 %1748, %v863_v44   ;;  %1030 = vperm.xlu1 %1749, %v859_v29  }
 0x36f   :  { %v878_v15 = vpop.permute.xlu0 %877 }
 0x370   :  { %v903_v42 = vrot.slane %v878_v15, %v2357_v1 }
 0x373   :  { %v893_v55 = vpop.permute.xlu0 %892 }
 0x374   :  { %v926_v17 = vrot.slane %v893_v55, %v2351_v50 }
 0x377   :  { %v881_v37 = vpop.permute.xlu1 %880  ;;  %v896_v35 = vpop.permute.xlu0 %895 }
 0x378   :  { %v907_v60 = vrot.slane %v881_v37, %v2351_v50  ;;  %v931_v26 = vrot.slane %v896_v35, %v2354_v52 }
 0x37a   :  { %v908_v56 = vsel %vm737_vm1, %v907_v60, %v903_v42 }
 0x37b   :  { %v890_v2 = vpop.permute.xlu1 %889  ;;  %v899_v7 = vpop.permute.xlu0 %898 }
 0x37c   :  { %v922_v61 = vrot.slane %v890_v2, %v2357_v1  ;;  %v936_v8 = vrot.slane %v899_v7, %v2360_v30 }
 0x37e   :  { %v927_v58 = vsel %vm737_vm1, %v926_v17, %v922_v61 }
 0x37f   :  { %v884_v11 = vpop.permute.xlu1 %883  ;;  %v932_v63 = vsel %vm744_vm2, %v931_v26, %v927_v58 }
 0x380   :  { %v912_v36 = vrot.slane %v884_v11, %v2354_v52  ;;  %v937_v51 = vsel %vm751_vm3, %v936_v8, %v932_v63 }
 0x382   :  { %v913_v49 = vsel %vm744_vm2, %v912_v36, %v908_v56 }
 0x383   :  { %v887_v4 = vpop.permute.xlu1 %886 }
 0x384   :  { %v917_v5 = vrot.slane %v887_v4, %v2360_v30 }
 0x386   :  { %v918_v16 = vsel %vm751_vm3, %v917_v5, %v913_v49 }
 0x387   :  { %v938_v20 = vsel %vm772_vm4, %v937_v51, %v918_v16  ;;  %v1394_v51 = vld [vmem:[%s2556_s8] sm:$0xf] }
 0x388   :  { %1701 = vmatmul.mubr.msk.f32.vlgmr.msra.gmra.mxu0 %vm939_vm6, %v938_v20 }
 0x389   :  { %1716 = vmatprep.mubr.msk.f32.mxu0 %vm1862_vm5, %v1860_v19  ;;  %1715 = vmatpush3.msk.msra.mxu0 %vm390_vm13, %v1394_v51 }
 0x38c   :  { %1390 = vadd.xlane.f32.xlu0 %v1389_v34 }
 0x391   :  { %1385 = vadd.xlane.f32.xlu1 %v1384_v47 }
 0x3d6   :  { %v1022_v48 = vpop.permute.xlu1 %1021 }
 0x3d7   :  { %v1047_v35 = vrot.slane %v1022_v48, %v2357_v1 }
 0x3da   :  { %v1025_v41 = vpop.permute.xlu0 %1024  ;;  %v1034_v3 = vpop.permute.xlu1 %1033 }
 0x3db   :  { %v1051_v44 = vrot.slane %v1025_v41, %v2351_v50  ;;  %v1066_v2 = vrot.slane %v1034_v3, %v2357_v1  ;;  %v1668_v41 = vld [vmem:[#allocation7] ss:$0 sm:$0xff] }
 0x3dd   :  { %v1052_v11 = vsel %vm737_vm1, %v1051_v44, %v1047_v35 }
 0x3de   :  { %v1037_v57 = vpop.permute.xlu0 %1036 }
 0x3df   :  { %v1070_v15 = vrot.slane %v1037_v57, %v2351_v50 }
 0x3e1   :  { %v1071_v60 = vsel %vm737_vm1, %v1070_v15, %v1066_v2 }
 0x3e2   :  { %v1028_v10 = vpop.permute.xlu1 %1027  ;;  %v1040_v29 = vpop.permute.xlu0 %1039 }
 0x3e3   :  { %v1056_v55 = vrot.slane %v1028_v10, %v2354_v52  ;;  %v1075_v37 = vrot.slane %v1040_v29, %v2354_v52  ;;  %v1175_v29 = vrot.slane %v2099_v24, %v1948_v6 }
 0x3e5   :  { %v1057_v7 = vsel %vm744_vm2, %v1056_v55, %v1052_v11  ;;  %v1076_v36 = vsel %vm744_vm2, %v1075_v37, %v1071_v60  ;;  %v1669_v37 = vld [vmem:[%s2554_s6] ss:$0 sm:$0xff] }
 0x3e8   :  { %v1031_v61 = vpop.permute.xlu1 %1030  ;;  %v1043_v17 = vpop.permute.xlu0 %1042 }
 0x3e9   :  { %v1061_v58 = vrot.slane %v1031_v61, %v2360_v30  ;;  %v1080_v26 = vrot.slane %v1043_v17, %v2360_v30 }
 0x3eb   :  { %v1062_v42 = vsel %vm751_vm3, %v1061_v58, %v1057_v7  ;;  %v1081_v63 = vsel %vm751_vm3, %v1080_v26, %v1076_v36 }
 0x3ec   :  { %v1082_v4 = vsel %vm772_vm4, %v1081_v63, %v1062_v42 }
 0x3ed   :  { %1712 = vmatmul.mubr.msk.f32.vlgmr.msra.gmra.mxu1 %vm939_vm6, %v1082_v4 }
 0x3ee   :  { %1727 = vmatprep.mubr.msk.f32.mxu1 %vm1862_vm5, %v1860_v19 }
 0x415   :  { %v1391_v49 = vpop.xlane.xlu0 %1390 }
 0x416   :  { %v1393_v20 = vmul.f32 0.00390625, %v1391_v49 }
 0x418   :  { %v1411_v21 = vrot.slane %v1393_v20, %v2357_v1 }
 0x41a   :  { %v1386_v5 = vpop.xlane.xlu1 %1385 }
 0x41b   :  { %v1392_v16 = vmul.f32 0.00390625, %v1386_v5 }
 0x41d   :  { %v1407_v59 = vrot.slane %v1392_v16, %v2357_v1 }
 0x41f   :  { %v1412_v22 = vsel %vm772_vm4, %v1411_v21, %v1407_v59 }
 0x420   :  { %1717 = vmatmul.mubr.msk.f32.vlgmr.msra.gmra.mxu0 %vm1413_vm7, %v1412_v22 }
 0x448   :  { %v1008_v56 = vpop.f32.mrf.mxu0 }
 0x449   :  { %v1155_v25 = vmul.f32 0.0009765625, %v1008_v56 }
 0x44a   :  { %v1702_v8 = vpop.f32.mrf.mxu0 }
 0x44b   :  { %v1157_v12 = vmul.f32 %v1155_v25, %v1155_v25  ;;  %v1177_v15 = vsub.f32 %v1175_v29, %v1155_v25 }
 0x4ad   :  { %v1151_v23 = vpop.f32.mrf.mxu1 }
 0x4ae   :  { %v1156_v27 = vmul.f32 0.0009765625, %v1151_v23 }
 0x4af   :  { %v1713_v38 = vpop.f32.mrf.mxu1 }
 0x4b0   :  { %v1158_v34 = vsub.f32 %v1156_v27, %v1157_v12 }
 0x4b2   :  { %v1159_v47 = vmax.f32 %v1158_v34, 0.0 }
 0x4b4   :  { %v1160_v48 = vadd.f32 1e-05, %v1159_v47 }
 0x4b6   :  { %1754 = vrsqrt.f32 %v1160_v48 }
 0x4c3   :  { %v1755_v57 = vpop.eup %1754 }
 0x4c4   :  { %v1169_v3 = vmul.f32 %v1755_v57, %v1668_v41 }
 0x4c6   :  { %v1189_v10 = vrot.slane %v1169_v3, %v1948_v6  ;;  %v1208_v44 = vrot.slane %v1169_v3, %v1965_v18  ;;  %v1178_v55 = vmul.f32 %v1177_v15, %v1169_v3 }
 0x4c8   :  { %1195 = vbcast.lane.b32.xlu1 %v1189_v10, 264  ;;  %1191 = vbcast.lane.b32.xlu0 %v1189_v10, 256  ;;  %v1185_v35 = vadd.f32 %v1669_v37, %v1178_v55 }
 0x4ca   :  { %v1243_v2 = vrot.slane %v1185_v35, %v1948_v6  ;;  %v1262_v24 = vrot.slane %v1185_v35, %v1965_v18 }
 0x4cc   :  { %1210 = vbcast.lane.b32.xlu1 %v1208_v44, 256  ;;  %1214 = vbcast.lane.b32.xlu0 %v1208_v44, 264 }
 0x4d0   :  { %1199 = vbcast.lane.b32.xlu1 %v1189_v10, 272  ;;  %1218 = vbcast.lane.b32.xlu0 %v1208_v44, 272 }
 0x4d4   :  { %1203 = vbcast.lane.b32.xlu1 %v1189_v10, 280  ;;  %1222 = vbcast.lane.b32.xlu0 %v1208_v44, 280 }
 0x4d8   :  { %1249 = vbcast.lane.b32.xlu0 %v1243_v2, 264  ;;  %1245 = vbcast.lane.b32.xlu1 %v1243_v2, 256 }
 0x4dc   :  { %1268 = vbcast.lane.b32.xlu0 %v1262_v24, 264  ;;  %1264 = vbcast.lane.b32.xlu1 %v1262_v24, 256 }
 0x4e0   :  { %1272 = vbcast.lane.b32.xlu0 %v1262_v24, 272  ;;  %1253 = vbcast.lane.b32.xlu1 %v1243_v2, 272 }
 0x4e4   :  { %1276 = vbcast.lane.b32.xlu0 %v1262_v24, 280  ;;  %1257 = vbcast.lane.b32.xlu1 %v1243_v2, 280 }
 0x53a   :  { %v1196_v61 = vpop.permute.xlu1 %1195  ;;  %v1192_v17 = vpop.permute.xlu0 %1191 }
 0x53b   :  { %v1226_v6 = vmul.f32 %v1196_v61, %v2260_v40  ;;  %v1227_v42 = vmul.f32 %v1196_v61, %v2266_v43  ;;  %v1224_v18 = vmul.f32 %v1192_v17, %v2244_v28  ;;  %v1225_v63 = vmul.f32 %v1192_v17, %v2248_v32 }
 0x53e   :  { %v1211_v11 = vpop.permute.xlu1 %1210  ;;  %v1215_v60 = vpop.permute.xlu0 %1214 }
 0x53f   :  { %v1232_v4 = vmul.f32 %v1211_v11, %v2246_v31  ;;  %v1233_v56 = vmul.f32 %v1211_v11, %v2250_v33  ;;  %v1234_v8 = vmul.f32 %v1215_v60, %v2258_v39  ;;  %v1235_v5 = vmul.f32 %v1215_v60, %v2270_v45 }
 0x542   :  { %v1200_v58 = vpop.permute.xlu1 %1199  ;;  %v1219_v26 = vpop.permute.xlu0 %1218 }
 0x543   :  { %v1228_v49 = vmul.f32 %v1200_v58, %v2272_v46  ;;  %v1229_v51 = vmul.f32 %v1200_v58, %v2280_v62  ;;  %v1236_v40 = vmul.f32 %v1219_v26, %v2294_v53  ;;  %v1237_v43 = vmul.f32 %v1219_v26, %v2298_v13 }
 0x546   :  { %v1204_v7 = vpop.permute.xlu1 %1203  ;;  %v1223_v36 = vpop.permute.xlu0 %1222 }
 0x547   :  { %v1230_v33 = vmul.f32 %v1204_v7, %v2296_v54  ;;  %v1231_v39 = vmul.f32 %v1204_v7, %v2300_v14  ;;  %v1238_v45 = vmul.f32 %v1223_v36, %v2310_v0  ;;  %v1239_v46 = vmul.f32 %v1223_v36, %v2312_v9 }
 0x54a   :  { %v1246_v16 = vpop.permute.xlu1 %1245  ;;  %v1250_v28 = vpop.permute.xlu0 %1249 }
 0x54b   :  { %v1278_v20 = vadd.f32 %v1246_v16, %v1224_v18  ;;  %v1279_v32 = vadd.f32 %v1246_v16, %v1225_v63  ;;  %v1280_v59 = vadd.f32 %v1250_v28, %v1226_v6  ;;  %v1281_v31 = vadd.f32 %v1250_v28, %v1227_v42 }
 0x54d   :  { %vm1294_vm8 = vcmp.gt.f32.partialorder %v1278_v20, 0.0  ;;  %vm1295_vm9 = vcmp.gt.f32.partialorder %v1279_v32, 0.0  ;;  %v1310_v62 = vmul.f32 0.01, %v1278_v20  ;;  %v1311_v53 = vmul.f32 0.01, %v1279_v32 }
 0x54e   :  { %vm1296_vm10 = vcmp.gt.f32.partialorder %v1280_v59, 0.0  ;;  %vm1297_vm11 = vcmp.gt.f32.partialorder %v1281_v31, 0.0  ;;  %v1312_v13 = vmul.f32 0.01, %v1280_v59  ;;  %v1313_v21 = vmul.f32 0.01, %v1281_v31  ;;  %v1265_v22 = vpop.permute.xlu1 %1264  ;;  %v1269_v25 = vpop.permute.xlu0 %1268 }
 0x54f   :  { %v1286_v23 = vadd.f32 %v1265_v22, %v1232_v4  ;;  %v1287_v12 = vadd.f32 %v1265_v22, %v1233_v56  ;;  %v1288_v27 = vadd.f32 %v1269_v25, %v1234_v8  ;;  %v1289_v54 = vadd.f32 %v1269_v25, %v1235_v5  ;;  %v1541_v22 = vld [vmem:[%s2558_s10] sm:$0xff] }
 0x550   :  { %v1326_v38 = vsel %vm1294_vm8, %v1278_v20, %v1310_v62  ;;  %v1327_v14 = vsel %vm1295_vm9, %v1279_v32, %v1311_v53  ;;  %v1328_v34 = vsel %vm1296_vm10, %v1280_v59, %v1312_v13  ;;  %v1329_v0 = vsel %vm1297_vm11, %v1281_v31, %v1313_v21  ;;  %v1544_v53 = vld [vmem:[%s2558_s10 + $0x18] sm:$0xff]  ;;  %v1543_v13 = vld [vmem:[%s2558_s10 + $0x10] sm:$0xff]  ;;  %v1542_v21 = vld [vmem:[%s2558_s10 + $0x8] sm:$0xff] }
 0x551   :  { %vm1302_vm12 = vcmp.gt.f32.partialorder %v1286_v23, 0.0  ;;  %vm1303_vm13 = vcmp.gt.f32.partialorder %v1287_v12, 0.0  ;;  %v1318_v9 = vmul.f32 0.01, %v1286_v23  ;;  %v1319_v47 = vmul.f32 0.01, %v1287_v12  ;;  %1720 = vmatpush3.msra.mxu1 %v1544_v53 }
 0x552   :  { %vm1304_vm14 = vcmp.gt.f32.partialorder %v1288_v27, 0.0  ;;  %vm1305_vm15 = vcmp.gt.f32.partialorder %v1289_v54, 0.0  ;;  %v1320_v48 = vmul.f32 0.01, %v1288_v27  ;;  %v1321_v41 = vmul.f32 0.01, %v1289_v54  ;;  %v1254_v57 = vpop.permute.xlu1 %1253  ;;  %v1273_v3 = vpop.permute.xlu0 %1272  ;;  %1721 = vmatprep.subr.mxu1 %v1860_v19 }
 0x553   :  { %v1282_v10 = vadd.f32 %v1254_v57, %v1228_v49  ;;  %v1283_v29 = vadd.f32 %v1254_v57, %v1229_v51  ;;  %v1342_v44 = vadd.f32 %v1327_v14, %v1326_v38  ;;  %v1345_v15 = vadd.f32 %v1329_v0, %v1328_v34  ;;  %1722 = vmatpush3.msra.mxu1 %v1543_v13 }
 0x554   :  { %v1290_v55 = vadd.f32 %v1273_v3, %v1236_v40  ;;  %v1291_v37 = vadd.f32 %v1273_v3, %v1237_v43  ;;  %v1334_v35 = vsel %vm1302_vm12, %v1286_v23, %v1318_v9  ;;  %v1335_v2 = vsel %vm1303_vm13, %v1287_v12, %v1319_v47  ;;  %1723 = vmatprep.subr.mxu1 %v1860_v19 }
 0x555   :  { %vm1298_vm0 = vcmp.gt.f32.partialorder %v1282_v10, 0.0  ;;  %vm1299_vm5 = vcmp.gt.f32.partialorder %v1283_v29, 0.0  ;;  %v1314_v24 = vmul.f32 0.01, %v1282_v10  ;;  %v1315_v61 = vmul.f32 0.01, %v1283_v29  ;;  %1343 = vadd.xlane.f32.xlu1 %v1342_v44  ;;  %1346 = vadd.xlane.f32.xlu0 %v1345_v15 }
 0x556   :  { %vm1306_vm7 = vcmp.gt.f32.partialorder %v1290_v55, 0.0  ;;  %vm1307_vm8 = vcmp.gt.f32.partialorder %v1291_v37, 0.0  ;;  %v1322_v17 = vmul.f32 0.01, %v1290_v55  ;;  %v1323_v11 = vmul.f32 0.01, %v1291_v37  ;;  %v1258_v60 = vpop.permute.xlu1 %1257  ;;  %v1277_v58 = vpop.permute.xlu0 %1276  ;;  %1724 = vmatpush3.msra.mxu1 %v1542_v21 }
 0x557   :  { %v1284_v26 = vadd.f32 %v1258_v60, %v1230_v33  ;;  %v1285_v7 = vadd.f32 %v1258_v60, %v1231_v39  ;;  %v1354_v36 = vadd.f32 %v1335_v2, %v1334_v35  ;;  %v1336_v6 = vsel %vm1304_vm14, %v1288_v27, %v1320_v48  ;;  %1725 = vmatprep.subr.mxu1 %v1860_v19 }
 0x558   :  { %v1337_v42 = vsel %vm1305_vm15, %v1289_v54, %v1321_v41  ;;  %v1292_v18 = vadd.f32 %v1277_v58, %v1238_v45  ;;  %v1293_v63 = vadd.f32 %v1277_v58, %v1239_v46  ;;  %v1330_v4 = vsel %vm1298_vm0, %v1282_v10, %v1314_v24  ;;  %v1485_v46 = vpop.f32.mrf.mxu0  ;;  %1726 = vmatpush3.msra.mxu1 %v1541_v22 }
 0x559   :  { %vm1300_vm9 = vcmp.gt.f32.partialorder %v1284_v26, 0.0  ;;  %vm1301_vm10 = vcmp.gt.f32.partialorder %v1285_v7, 0.0  ;;  %v1316_v56 = vmul.f32 0.01, %v1284_v26  ;;  %v1317_v8 = vmul.f32 0.01, %v1285_v7  ;;  %1355 = vadd.xlane.f32.xlu0 %v1354_v36 }
 0x55a   :  { %v1357_v5 = vadd.f32 %v1337_v42, %v1336_v6  ;;  %vm1308_vm11 = vcmp.gt.f32.partialorder %v1292_v18, 0.0  ;;  %vm1309_vm12 = vcmp.gt.f32.partialorder %v1293_v63, 0.0  ;;  %v1324_v49 = vmul.f32 0.01, %v1292_v18  ;;  %v1718_v62 = vpop.f32.mrf.mxu0  ;;  %v1673_v6 = vld [vmem:[%s2559_s11] ss:$0 sm:$0xff] }
 0x55b   :  { %v1325_v51 = vmul.f32 0.01, %v1293_v63  ;;  %v1331_v40 = vsel %vm1299_vm5, %v1283_v29, %v1315_v61  ;;  %v1338_v43 = vsel %vm1306_vm7, %v1290_v55, %v1322_v17  ;;  %v1339_v16 = vsel %vm1307_vm8, %v1291_v37, %v1323_v11  ;;  %v1670_v37 = vld [vmem:[%s2557_s9] ss:$0 sm:$0xff]  ;;  %s1820_s11 = scalar_lea.vmem %s1645_s17, 32 }
 0x55c   :  { %1358 = vadd.xlane.f32.xlu1 %v1357_v5  ;;  %v1348_v28 = vadd.f32 %v1331_v40, %v1330_v4  ;;  %v1360_v20 = vadd.f32 %v1339_v16, %v1338_v43  ;;  %v1332_v32 = vsel %vm1300_vm9, %v1284_v26, %v1316_v56  ;;  %v1333_v59 = vsel %vm1301_vm10, %v1285_v7, %v1317_v8  ;;  %p1821_p1 = scmp.ne.s32.totalorder %s1645_s17, %s1820_s11  ;;  %p1826_p3 = scmp.lt.s32.totalorder %s1820_s11, %s1820_s11 }
 0x55d   :  { %v1340_v31 = vsel %vm1308_vm11, %v1292_v18, %v1324_v49  ;;  %v1341_v33 = vsel %vm1309_vm12, %v1293_v63, %v1325_v51  ;;  %v1351_v39 = vadd.f32 %v1333_v59, %v1332_v32 }
 0x55e   :  { %1349 = vadd.xlane.f32.xlu0 %v1348_v28  ;;  %v1363_v45 = vadd.f32 %v1341_v33, %v1340_v31  ;;  %p1827_p4 = por %p1826_p3, %p1825_p2 }
 0x560   :  { %1361 = vadd.xlane.f32.xlu1 %v1360_v20  ;;  %p1828_p5 = pnand %p1827_p4, %p1821_p1 }
 0x562   :  { %1352 = vadd.xlane.f32.xlu0 %v1351_v39 }
 0x564   :  { %1364 = vadd.xlane.f32.xlu1 %v1363_v45 }
 0x5de   :  { %v1347_v25 = vpop.xlane.xlu0 %1346  ;;  %v1344_v23 = vpop.xlane.xlu1 %1343 }
 0x5df   :  { %v1366_v54 = vmul.f32 0.00390625, %v1344_v23  ;;  %v1367_v38 = vmul.f32 0.00390625, %v1347_v25 }
 0x5e1   :  { %v1500_v48 = vrot.slane %v1366_v54, %v2357_v1  ;;  %v1504_v41 = vrot.slane %v1367_v38, %v2351_v50 }
 0x5e2   :  { %v1356_v12 = vpop.xlane.xlu0 %1355 }
 0x5e3   :  { %v1370_v0 = vmul.f32 0.00390625, %v1356_v12  ;;  %v1505_v35 = vsel %vm737_vm1, %v1504_v41, %v1500_v48 }
 0x5e5   :  { %v1359_v27 = vpop.xlane.xlu1 %1358  ;;  %v1519_v29 = vrot.slane %v1370_v0, %v2357_v1  ;;  %v1486_v1 = vadd.f32 %v1670_v37, %v1485_v46 }
 0x5e6   :  { %v1371_v34 = vmul.f32 0.00390625, %v1359_v27 }
 0x5e7   :  { %v1350_v14 = vpop.xlane.xlu0 %1349 }
 0x5e8   :  { %v1368_v9 = vmul.f32 0.00390625, %v1350_v14  ;;  %v1523_v10 = vrot.slane %v1371_v34, %v2351_v50 }
 0x5e9   :  { %v1362_v47 = vpop.xlane.xlu1 %1361 }
 0x5ea   :  { %v1372_v57 = vmul.f32 0.00390625, %v1362_v47  ;;  %v1509_v3 = vrot.slane %v1368_v9, %v2354_v52  ;;  %v1524_v17 = vsel %vm737_vm1, %v1523_v10, %v1519_v29  ;;  %vm1625_vm1 = vcmask 58368  }
 0x5eb   :  { %v1353_v19 = vpop.xlane.xlu0 %1352 }
 0x5ec   :  { %v1369_v44 = vmul.f32 0.00390625, %v1353_v19  ;;  %v1528_v15 = vrot.slane %v1372_v57, %v2354_v52  ;;  %v1510_v61 = vsel %vm744_vm2, %v1509_v3, %v1505_v35 }
 0x5ed   :  { %v1365_v55 = vpop.xlane.xlu1 %1364 }
 0x5ee   :  { %v1373_v2 = vmul.f32 0.00390625, %v1365_v55  ;;  %v1514_v24 = vrot.slane %v1369_v44, %v2360_v30  ;;  %v1529_v52 = vsel %vm744_vm2, %v1528_v15, %v1524_v17 }
 0x5f0   :  { %v1533_v50 = vrot.slane %v1373_v2, %v2360_v30  ;;  %v1515_v11 = vsel %vm751_vm3, %v1514_v24, %v1510_v61 }
 0x5f2   :  { %v1534_v60 = vsel %vm751_vm3, %v1533_v50, %v1529_v52 }
 0x5f3   :  { %v1535_v58 = vsel %vm772_vm4, %v1534_v60, %v1515_v11 }
 0x5f4   :  { %v1537_v26 = vadd.f32 %v1535_v58, %v1486_v1 }
 0x5f6   :  { %vm1538_vm13 = vcmp.gt.f32.partialorder %v1537_v26, 0.0  ;;  %v1539_v7 = vmul.f32 0.01, %v1537_v26 }
 0x5f8   :  { %v1540_v36 = vsel %vm1538_vm13, %v1537_v26, %v1539_v7 }
 0x5f9   :  { %1728 = vmatmul.mubr.msk.f32.vlgmr.msra.gmra.mxu1 %vm939_vm6, %v1540_v36 }
 0x6b9   :  { %v1621_v30 = vpop.f32.mrf.mxu1 }
 0x6ba   :  { %v1622_v42 = vadd.f32 %v1673_v6, %v1621_v30 }
 0x6bb   :  { %v1729_v18 = vpop.f32.mrf.mxu1 }
 0x6bc   :  { %v1626_v63 = vsel %vm1625_vm1, %v1622_v42, -inf }
 0x6bd   :  { %1627 = vmax.xlane.f32.xlu0 %v1626_v63 }
 0x746   :  { %v1628_v4 = vpop.xlane.xlu0 %1627 }
 0x747   :  { %v1629_v56 = vsub.f32 %v1622_v42, %v1628_v4 }
 0x749   :  { %v1630_v8 = vmul.f32 1.442695, %v1629_v56 }
 0x74b   :  { %1756 = vpow2.f32 %v1630_v8 }
 0x758   :  { %v1757_v5 = vpop.eup %1756 }
 0x759   :  { %v1632_v49 = vsel %vm1625_vm1, %v1757_v5, 0.0 }
 0x75a   :  { %1633 = vadd.xlane.f32.xlu1 %v1632_v49 }
 0x7e3   :  { %v1634_v51 = vpop.xlane.xlu1 %1633 }
 0x7e4   :  { %1758 = vrcp.f32 %v1634_v51 }
 0x7f1   :  { %v1759_v40 = vpop.eup %1758 }
 0x7f2   :  { %v1636_v43 = vmul.f32 %v1759_v40, %v1757_v5 }
 0x7f4   :  { %1637 = vst.msk [vmem:[#allocation8] sm:$0x3] %vm1625_vm1, %v1636_v43 }
 0x7f5   :  { %1831 = shalt.err (!%p1828_p5)
}
 0x7f6   :  { %1647 = dma.vmem_to_hbm [thread:$0]  %s1645_s17, 32, %s2560_s12, [#allocation4]  }
 0x7f7   :  { %1844 = dma.done.wait [#allocation4], 32  }
 0x7f8   :  { %1845 = vsyncadd [#allocation4], 4294967264 }
 0x7f9   :  { %1651 = vsyncpa [#allocation3], 1 }
 0x7fa   :  { %1652 = vsyncpa [#allocation6], 1 }
 0x7fb   :  { %1653 = vsyncpa [#allocation4], 1 }

</bundles_post_ra>
